<compile_context>
chip_gen: v6e
topology: v6e:2x2x1
jax: 0.10.0
libtpu: 0.0.40
codegen_flags: <defaults>
</compile_context>

<pallas_src>
import jax
import jax.numpy as jnp
from jax.experimental import pallas as pl
from jax.experimental.pallas import tpu as pltpu


def _make_kernel(num_layers, T, tile_b, H, D_out):
    """Build the Pallas kernel for fixed (static) shapes / layer count."""

    def kernel(*refs):
        idx = 0
        pre0_ref = refs[idx]; idx += 1                       # (T, tile_b, 4H)
        w_hh_refs = refs[idx:idx + num_layers]; idx += num_layers
        w_ih_refs = refs[idx:idx + num_layers - 1]; idx += num_layers - 1
        b_refs = refs[idx:idx + num_layers - 1]; idx += num_layers - 1
        attn_w_ref, attn_b_ref, fcw_ctx_ref, fcw_enc_ref, fc_b_ref = \
            refs[idx:idx + 5]
        idx += 5
        out_ref = refs[idx]                                  # (tile_b, D_out)

        f32 = jnp.float32

        def run_layer(get_pre, w_hh, is_last):
            """Serial recurrence; only h @ W_hh sits on the dependence chain."""
            h = jnp.zeros((tile_b, H), f32)
            c = jnp.zeros((tile_b, H), f32)
            ctx = jnp.zeros((tile_b, H), f32)
            outs = []
            # Static unroll: T is small and compile-time constant.  For large
            # T switch to lax.fori_loop(..., unroll=k) with (h, c, ctx) carries.
            for t in range(T):
                gates = get_pre(t) + jnp.dot(
                    h, w_hh, preferred_element_type=f32)     # (tile_b, 4H)
                sig = jax.nn.sigmoid(gates)                  # whole-vreg EUP
                th = jnp.tanh(gates)                         # whole-vreg EUP
                i_g = sig[:, 0:H]
                f_g = sig[:, H:2 * H]
                o_g = sig[:, 3 * H:4 * H]
                g_g = th[:, 2 * H:3 * H]
                c = f_g * c + i_g * g_g
                h = o_g * jnp.tanh(c)
                if is_last:
                    ctx = ctx + h                            # fused context sum
                else:
                    outs.append(h)
            return h, outs, ctx

        # ---- layer 0: pre-gates come straight from the wrapper ----
        get_pre = lambda t: pre0_ref[t]
        h_last, outs, ctx = None, None, None
        for l in range(num_layers):
            w_hh = w_hh_refs[l][...]                         # hoisted read
            is_last = (l == num_layers - 1)
            h_last, outs, ctx = run_layer(get_pre, w_hh, is_last)
            if not is_last:
                # Hoisted input projection for layer l+1: one batched matmul
                # over all timesteps instead of T tiny ones inside the loop.
                prev = jnp.concatenate(outs, axis=0)         # (T*tile_b, H)
                pre2d = (jnp.dot(prev, w_ih_refs[l][...],
                                 preferred_element_type=f32)
                         + b_refs[l][...])                   # (T*tile_b, 4H)
                get_pre = (lambda p:
                           lambda t: p[t * tile_b:(t + 1) * tile_b, :])(pre2d)

        # ---- attention head ----
        enc = (jnp.dot(h_last, attn_w_ref[...], preferred_element_type=f32)
               + attn_b_ref[...])                            # (tile_b, H)
        # softmax over the size-1 score axis is identically 1, so the attended
        # context is simply sum_t h_t (accumulated in the last layer's loop).
        slope = jnp.float32(0.01)                            # LeakyReLU default
        ctx_a = jnp.where(ctx >= 0, ctx, slope * ctx)
        enc_a = jnp.where(enc >= 0, enc, slope * enc)
        result = (jnp.dot(ctx_a, fcw_ctx_ref[...], preferred_element_type=f32)
                  + jnp.dot(enc_a, fcw_enc_ref[...], preferred_element_type=f32)
                  + fc_b_ref[...])
        out_ref[...] = result.astype(out_ref.dtype)

    return kernel


def lstm_attn_forward(x, params):
    """x: (B, T, D_in) float32.  Returns (B, D_out) float32."""
    B, T, D_in = x.shape
    H = params["w_hh"][0].shape[0]
    D_out = params["fc_w"].shape[1]
    num_layers = len(params["w_ih"])

    # Batch tiling: shards independent sequences across TCs on v7x and bounds
    # per-step VMEM for large B; degenerates to one tile for tiny B.
    tile_b = 8 if B % 8 == 0 else B
    grid = (B // tile_b,)

    # Layer-0 input projection has no recurrence -> hoist it out of the kernel
    # entirely (one big XLA matmul over all T*B rows).
    x_tm = jnp.transpose(x, (1, 0, 2)).astype(jnp.float32)        # (T, B, D_in)
    pre0 = (jnp.einsum("tbd,dg->tbg", x_tm, params["w_ih"][0])
            + params["b"][0]).astype(jnp.float32)                 # (T, B, 4H)

    # Pre-split fc weight so the kernel never slices weights.
    fc_w_ctx = params["fc_w"][:H, :]
    fc_w_enc = params["fc_w"][H:, :]

    inputs = [pre0]
    inputs += [params["w_hh"][l] for l in range(num_layers)]
    inputs += [params["w_ih"][l] for l in range(1, num_layers)]
    inputs += [params["b"][l] for l in range(1, num_layers)]
    inputs += [params["attn_w"], params["attn_b"], fc_w_ctx, fc_w_enc,
               params["fc_b"]]

    def _full_spec(arr):
        nd = arr.ndim
        return pl.BlockSpec(arr.shape, lambda b, _nd=nd: (0,) * _nd)

    in_specs = [pl.BlockSpec((T, tile_b, 4 * H), lambda b: (0, b, 0))]
    in_specs += [_full_spec(a) for a in inputs[1:]]

    kernel = _make_kernel(num_layers, T, tile_b, H, D_out)

    return pl.pallas_call(
        kernel,
        out_shape=jax.ShapeDtypeStruct((B, D_out), jnp.float32),
        grid=grid,
        in_specs=in_specs,
        out_specs=pl.BlockSpec((tile_b, D_out), lambda b: (b, 0)),
        compiler_params=pltpu.CompilerParams(
            dimension_semantics=("parallel",)),
    )(*inputs)


def init_params(key, D_in, H, D_out, num_layers):
    """Deterministic synthetic parameters (PyTorch-style uniform init ranges)."""
    keys = list(jax.random.split(key, 4 * num_layers + 4))
    ki = iter(keys)
    k_lstm = 1.0 / (H ** 0.5)
    w_ih, w_hh, b = [], [], []
    for l in range(num_layers):
        in_dim = D_in if l == 0 else H
        w_ih.append(jax.random.uniform(next(ki), (in_dim, 4 * H), jnp.float32,
                                       -k_lstm, k_lstm))
        w_hh.append(jax.random.uniform(next(ki), (H, 4 * H), jnp.float32,
                                       -k_lstm, k_lstm))
        b_ih = jax.random.uniform(next(ki), (1, 4 * H), jnp.float32, -k_lstm, k_lstm)
        b_hh = jax.random.uniform(next(ki), (1, 4 * H), jnp.float32, -k_lstm, k_lstm)
        b.append(b_ih + b_hh)
    k_attn = 1.0 / (H ** 0.5)
    attn_w = jax.random.uniform(next(ki), (H, H), jnp.float32, -k_attn, k_attn)
    attn_b = jax.random.uniform(next(ki), (1, H), jnp.float32, -k_attn, k_attn)
    k_fc = 1.0 / ((2 * H) ** 0.5)
    fc_w = jax.random.uniform(next(ki), (2 * H, D_out), jnp.float32, -k_fc, k_fc)
    fc_b = jax.random.uniform(next(ki), (1, D_out), jnp.float32, -k_fc, k_fc)
    return dict(w_ih=w_ih, w_hh=w_hh, b=b,
                attn_w=attn_w, attn_b=attn_b, fc_w=fc_w, fc_b=fc_b)


def reference(x, params):
    """Pure-JAX reference mirroring the PyTorch forward exactly."""
    B, T, _ = x.shape
    H = params["w_hh"][0].shape[0]
    num_layers = len(params["w_ih"])
    seq = x.astype(jnp.float32)
    for l in range(num_layers):
        h = jnp.zeros((B, H), jnp.float32)
        c = jnp.zeros((B, H), jnp.float32)
        outs = []
        for t in range(T):
            gates = (seq[:, t, :] @ params["w_ih"][l]
                     + h @ params["w_hh"][l] + params["b"][l])
            i = jax.nn.sigmoid(gates[:, :H])
            f = jax.nn.sigmoid(gates[:, H:2 * H])
            g = jnp.tanh(gates[:, 2 * H:3 * H])
            o = jax.nn.sigmoid(gates[:, 3 * H:])
            c = f * c + i * g
            h = o * jnp.tanh(c)
            outs.append(h)
        seq = jnp.stack(outs, axis=1)
    out = seq                                              # (B, T, H)
    enc = out[:, -1, :] @ params["attn_w"] + params["attn_b"]
    scores = jnp.einsum("bth,bh->bt", out, enc)[..., None]  # (B, T, 1)
    attn = jax.nn.softmax(scores, axis=-1) * out
    context = jnp.sum(attn, axis=1)
    feat = jnp.concatenate([context, enc], axis=1)
    feat = jnp.where(feat >= 0, feat, 0.01 * feat)          # LeakyReLU
    return feat @ params["fc_w"] + params["fc_b"]


if __name__ == "__main__":
    B, T = 2, 8
    D_in, H, D_out, num_layers = 4, 32, 3, 2

    key = jax.random.PRNGKey(0)
    kx, kp = jax.random.split(key)
    x = jax.random.normal(kx, (B, T, D_in), jnp.float32)
    params = init_params(kp, D_in, H, D_out, num_layers)

    out = lstm_attn_forward(x, params)
    out = jax.block_until_ready(out)

    ref = reference(x, params)
    assert out.shape == (B, D_out)
    assert jnp.allclose(out, ref, atol=1e-4, rtol=1e-4), (out, ref)
    print("KERNEL_OK")
</pallas_src>

<mosaic_0001>
module attributes {stable_mosaic.version = 11 : i64} {
  func.func @kernel(%arg0: i32, %arg1: memref<8x2x128xf32, #tpu.memory_space<vmem>>, %arg2: memref<32x128xf32, #tpu.memory_space<vmem>>, %arg3: memref<32x128xf32, #tpu.memory_space<vmem>>, %arg4: memref<32x128xf32, #tpu.memory_space<vmem>>, %arg5: memref<1x128xf32, #tpu.memory_space<vmem>>, %arg6: memref<32x32xf32, #tpu.memory_space<vmem>>, %arg7: memref<1x32xf32, #tpu.memory_space<vmem>>, %arg8: memref<32x3xf32, #tpu.memory_space<vmem>>, %arg9: memref<32x3xf32, #tpu.memory_space<vmem>>, %arg10: memref<1x3xf32, #tpu.memory_space<vmem>>, %arg11: memref<2x3xf32, #tpu.memory_space<vmem>>) attributes {dimension_semantics = [#tpu.dimension_semantics<parallel>], iteration_bounds = array<i64: 1>, scalar_prefetch = 0 : i64, scratch_operands = 0 : i64, tpu.core_type = #tpu.core_type<tc>, window_params = [{transform_indices = @transform_0, window_bounds = array<i64: 8, 2, 128>}, {pipeline_mode = #tpu.pipeline_mode<synchronous>, transform_indices = @transform_1, window_bounds = array<i64: 32, 128>}, {pipeline_mode = #tpu.pipeline_mode<synchronous>, transform_indices = @transform_2, window_bounds = array<i64: 32, 128>}, {pipeline_mode = #tpu.pipeline_mode<synchronous>, transform_indices = @transform_3, window_bounds = array<i64: 32, 128>}, {pipeline_mode = #tpu.pipeline_mode<synchronous>, transform_indices = @transform_4, window_bounds = array<i64: 1, 128>}, {pipeline_mode = #tpu.pipeline_mode<synchronous>, transform_indices = @transform_5, window_bounds = array<i64: 32, 32>}, {pipeline_mode = #tpu.pipeline_mode<synchronous>, transform_indices = @transform_6, window_bounds = array<i64: 1, 32>}, {pipeline_mode = #tpu.pipeline_mode<synchronous>, transform_indices = @transform_7, window_bounds = array<i64: 32, 3>}, {pipeline_mode = #tpu.pipeline_mode<synchronous>, transform_indices = @transform_8, window_bounds = array<i64: 32, 3>}, {pipeline_mode = #tpu.pipeline_mode<synchronous>, transform_indices = @transform_9, window_bounds = array<i64: 1, 3>}, {transform_indices = @transform_10, window_bounds = array<i64: 2, 3>}]} {
    %c0 = arith.constant 0 : index
    %c0_0 = arith.constant 0 : index
    %0 = vector.load %arg2[%c0, %c0_0] : memref<32x128xf32, #tpu.memory_space<vmem>>, vector<32x128xf32>
    %cst = arith.constant 0.000000e+00 : f32
    %1 = vector.broadcast %cst : f32 to vector<2x32xf32>
    %cst_1 = arith.constant 0.000000e+00 : f32
    %2 = vector.broadcast %cst_1 : f32 to vector<2x32xf32>
    %c0_2 = arith.constant 0 : index
    %c0_3 = arith.constant 0 : index
    %c0_4 = arith.constant 0 : index
    %3 = vector.load %arg1[%c0_2, %c0_3, %c0_4] : memref<8x2x128xf32, #tpu.memory_space<vmem>>, vector<1x2x128xf32>
    %4 = vector.shape_cast %3 : vector<1x2x128xf32> to vector<2x128xf32>
    %cst_5 = arith.constant dense<0.000000e+00> : vector<2x128xf32>
    %5 = tpu.matmul %1, %0, %cst_5 {dimension_numbers = #tpu.dot_dimension_numbers<[1], [0], [0], [1], [0, 0, 1, 1], [], []>} : vector<2x32xf32>, vector<32x128xf32>, vector<2x128xf32> -> vector<2x128xf32>
    %6 = arith.addf %4, %5 : vector<2x128xf32>
    %7 = arith.negf %6 : vector<2x128xf32>
    %8 = math.exp %7 : vector<2x128xf32>
    %cst_6 = arith.constant 1.000000e+00 : f32
    %9 = vector.broadcast %cst_6 : f32 to vector<2x128xf32>
    %10 = arith.addf %9, %8 : vector<2x128xf32>
    %11 = arith.divf %9, %10 : vector<2x128xf32>
    %12 = math.tanh %6 : vector<2x128xf32>
    %13 = vector.extract_strided_slice %11 {offsets = [0, 0], sizes = [2, 32], strides = [1, 1]} : vector<2x128xf32> to vector<2x32xf32>
    %14 = vector.extract_strided_slice %11 {offsets = [0, 32], sizes = [2, 32], strides = [1, 1]} : vector<2x128xf32> to vector<2x32xf32>
    %15 = vector.extract_strided_slice %11 {offsets = [0, 96], sizes = [2, 32], strides = [1, 1]} : vector<2x128xf32> to vector<2x32xf32>
    %16 = vector.extract_strided_slice %12 {offsets = [0, 64], sizes = [2, 32], strides = [1, 1]} : vector<2x128xf32> to vector<2x32xf32>
    %17 = arith.mulf %14, %2 : vector<2x32xf32>
    %18 = arith.mulf %13, %16 : vector<2x32xf32>
    %19 = arith.addf %17, %18 : vector<2x32xf32>
    %20 = math.tanh %19 : vector<2x32xf32>
    %21 = arith.mulf %15, %20 : vector<2x32xf32>
    %c1 = arith.constant 1 : index
    %c0_7 = arith.constant 0 : index
    %c0_8 = arith.constant 0 : index
    %22 = vector.load %arg1[%c1, %c0_7, %c0_8] : memref<8x2x128xf32, #tpu.memory_space<vmem>>, vector<1x2x128xf32>
    %23 = vector.shape_cast %22 : vector<1x2x128xf32> to vector<2x128xf32>
    %cst_9 = arith.constant dense<0.000000e+00> : vector<2x128xf32>
    %24 = tpu.matmul %21, %0, %cst_9 {dimension_numbers = #tpu.dot_dimension_numbers<[1], [0], [0], [1], [0, 0, 1, 1], [], []>} : vector<2x32xf32>, vector<32x128xf32>, vector<2x128xf32> -> vector<2x128xf32>
    %25 = arith.addf %23, %24 : vector<2x128xf32>
    %26 = arith.negf %25 : vector<2x128xf32>
    %27 = math.exp %26 : vector<2x128xf32>
    %cst_10 = arith.constant 1.000000e+00 : f32
    %28 = vector.broadcast %cst_10 : f32 to vector<2x128xf32>
    %29 = arith.addf %28, %27 : vector<2x128xf32>
    %30 = arith.divf %28, %29 : vector<2x128xf32>
    %31 = math.tanh %25 : vector<2x128xf32>
    %32 = vector.extract_strided_slice %30 {offsets = [0, 0], sizes = [2, 32], strides = [1, 1]} : vector<2x128xf32> to vector<2x32xf32>
    %33 = vector.extract_strided_slice %30 {offsets = [0, 32], sizes = [2, 32], strides = [1, 1]} : vector<2x128xf32> to vector<2x32xf32>
    %34 = vector.extract_strided_slice %30 {offsets = [0, 96], sizes = [2, 32], strides = [1, 1]} : vector<2x128xf32> to vector<2x32xf32>
    %35 = vector.extract_strided_slice %31 {offsets = [0, 64], sizes = [2, 32], strides = [1, 1]} : vector<2x128xf32> to vector<2x32xf32>
    %36 = arith.mulf %33, %19 : vector<2x32xf32>
    %37 = arith.mulf %32, %35 : vector<2x32xf32>
    %38 = arith.addf %36, %37 : vector<2x32xf32>
    %39 = math.tanh %38 : vector<2x32xf32>
    %40 = arith.mulf %34, %39 : vector<2x32xf32>
    %c2 = arith.constant 2 : index
    %c0_11 = arith.constant 0 : index
    %c0_12 = arith.constant 0 : index
    %41 = vector.load %arg1[%c2, %c0_11, %c0_12] : memref<8x2x128xf32, #tpu.memory_space<vmem>>, vector<1x2x128xf32>
    %42 = vector.shape_cast %41 : vector<1x2x128xf32> to vector<2x128xf32>
    %cst_13 = arith.constant dense<0.000000e+00> : vector<2x128xf32>
    %43 = tpu.matmul %40, %0, %cst_13 {dimension_numbers = #tpu.dot_dimension_numbers<[1], [0], [0], [1], [0, 0, 1, 1], [], []>} : vector<2x32xf32>, vector<32x128xf32>, vector<2x128xf32> -> vector<2x128xf32>
    %44 = arith.addf %42, %43 : vector<2x128xf32>
    %45 = arith.negf %44 : vector<2x128xf32>
    %46 = math.exp %45 : vector<2x128xf32>
    %cst_14 = arith.constant 1.000000e+00 : f32
    %47 = vector.broadcast %cst_14 : f32 to vector<2x128xf32>
    %48 = arith.addf %47, %46 : vector<2x128xf32>
    %49 = arith.divf %47, %48 : vector<2x128xf32>
    %50 = math.tanh %44 : vector<2x128xf32>
    %51 = vector.extract_strided_slice %49 {offsets = [0, 0], sizes = [2, 32], strides = [1, 1]} : vector<2x128xf32> to vector<2x32xf32>
    %52 = vector.extract_strided_slice %49 {offsets = [0, 32], sizes = [2, 32], strides = [1, 1]} : vector<2x128xf32> to vector<2x32xf32>
    %53 = vector.extract_strided_slice %49 {offsets = [0, 96], sizes = [2, 32], strides = [1, 1]} : vector<2x128xf32> to vector<2x32xf32>
    %54 = vector.extract_strided_slice %50 {offsets = [0, 64], sizes = [2, 32], strides = [1, 1]} : vector<2x128xf32> to vector<2x32xf32>
    %55 = arith.mulf %52, %38 : vector<2x32xf32>
    %56 = arith.mulf %51, %54 : vector<2x32xf32>
    %57 = arith.addf %55, %56 : vector<2x32xf32>
    %58 = math.tanh %57 : vector<2x32xf32>
    %59 = arith.mulf %53, %58 : vector<2x32xf32>
    %c3 = arith.constant 3 : index
    %c0_15 = arith.constant 0 : index
    %c0_16 = arith.constant 0 : index
    %60 = vector.load %arg1[%c3, %c0_15, %c0_16] : memref<8x2x128xf32, #tpu.memory_space<vmem>>, vector<1x2x128xf32>
    %61 = vector.shape_cast %60 : vector<1x2x128xf32> to vector<2x128xf32>
    %cst_17 = arith.constant dense<0.000000e+00> : vector<2x128xf32>
    %62 = tpu.matmul %59, %0, %cst_17 {dimension_numbers = #tpu.dot_dimension_numbers<[1], [0], [0], [1], [0, 0, 1, 1], [], []>} : vector<2x32xf32>, vector<32x128xf32>, vector<2x128xf32> -> vector<2x128xf32>
    %63 = arith.addf %61, %62 : vector<2x128xf32>
    %64 = arith.negf %63 : vector<2x128xf32>
    %65 = math.exp %64 : vector<2x128xf32>
    %cst_18 = arith.constant 1.000000e+00 : f32
    %66 = vector.broadcast %cst_18 : f32 to vector<2x128xf32>
    %67 = arith.addf %66, %65 : vector<2x128xf32>
    %68 = arith.divf %66, %67 : vector<2x128xf32>
    %69 = math.tanh %63 : vector<2x128xf32>
    %70 = vector.extract_strided_slice %68 {offsets = [0, 0], sizes = [2, 32], strides = [1, 1]} : vector<2x128xf32> to vector<2x32xf32>
    %71 = vector.extract_strided_slice %68 {offsets = [0, 32], sizes = [2, 32], strides = [1, 1]} : vector<2x128xf32> to vector<2x32xf32>
    %72 = vector.extract_strided_slice %68 {offsets = [0, 96], sizes = [2, 32], strides = [1, 1]} : vector<2x128xf32> to vector<2x32xf32>
    %73 = vector.extract_strided_slice %69 {offsets = [0, 64], sizes = [2, 32], strides = [1, 1]} : vector<2x128xf32> to vector<2x32xf32>
    %74 = arith.mulf %71, %57 : vector<2x32xf32>
    %75 = arith.mulf %70, %73 : vector<2x32xf32>
    %76 = arith.addf %74, %75 : vector<2x32xf32>
    %77 = math.tanh %76 : vector<2x32xf32>
    %78 = arith.mulf %72, %77 : vector<2x32xf32>
    %c4 = arith.constant 4 : index
    %c0_19 = arith.constant 0 : index
    %c0_20 = arith.constant 0 : index
    %79 = vector.load %arg1[%c4, %c0_19, %c0_20] : memref<8x2x128xf32, #tpu.memory_space<vmem>>, vector<1x2x128xf32>
    %80 = vector.shape_cast %79 : vector<1x2x128xf32> to vector<2x128xf32>
    %cst_21 = arith.constant dense<0.000000e+00> : vector<2x128xf32>
    %81 = tpu.matmul %78, %0, %cst_21 {dimension_numbers = #tpu.dot_dimension_numbers<[1], [0], [0], [1], [0, 0, 1, 1], [], []>} : vector<2x32xf32>, vector<32x128xf32>, vector<2x128xf32> -> vector<2x128xf32>
    %82 = arith.addf %80, %81 : vector<2x128xf32>
    %83 = arith.negf %82 : vector<2x128xf32>
    %84 = math.exp %83 : vector<2x128xf32>
    %cst_22 = arith.constant 1.000000e+00 : f32
    %85 = vector.broadcast %cst_22 : f32 to vector<2x128xf32>
    %86 = arith.addf %85, %84 : vector<2x128xf32>
    %87 = arith.divf %85, %86 : vector<2x128xf32>
    %88 = math.tanh %82 : vector<2x128xf32>
    %89 = vector.extract_strided_slice %87 {offsets = [0, 0], sizes = [2, 32], strides = [1, 1]} : vector<2x128xf32> to vector<2x32xf32>
    %90 = vector.extract_strided_slice %87 {offsets = [0, 32], sizes = [2, 32], strides = [1, 1]} : vector<2x128xf32> to vector<2x32xf32>
    %91 = vector.extract_strided_slice %87 {offsets = [0, 96], sizes = [2, 32], strides = [1, 1]} : vector<2x128xf32> to vector<2x32xf32>
    %92 = vector.extract_strided_slice %88 {offsets = [0, 64], sizes = [2, 32], strides = [1, 1]} : vector<2x128xf32> to vector<2x32xf32>
    %93 = arith.mulf %90, %76 : vector<2x32xf32>
    %94 = arith.mulf %89, %92 : vector<2x32xf32>
    %95 = arith.addf %93, %94 : vector<2x32xf32>
    %96 = math.tanh %95 : vector<2x32xf32>
    %97 = arith.mulf %91, %96 : vector<2x32xf32>
    %c5 = arith.constant 5 : index
    %c0_23 = arith.constant 0 : index
    %c0_24 = arith.constant 0 : index
    %98 = vector.load %arg1[%c5, %c0_23, %c0_24] : memref<8x2x128xf32, #tpu.memory_space<vmem>>, vector<1x2x128xf32>
    %99 = vector.shape_cast %98 : vector<1x2x128xf32> to vector<2x128xf32>
    %cst_25 = arith.constant dense<0.000000e+00> : vector<2x128xf32>
    %100 = tpu.matmul %97, %0, %cst_25 {dimension_numbers = #tpu.dot_dimension_numbers<[1], [0], [0], [1], [0, 0, 1, 1], [], []>} : vector<2x32xf32>, vector<32x128xf32>, vector<2x128xf32> -> vector<2x128xf32>
    %101 = arith.addf %99, %100 : vector<2x128xf32>
    %102 = arith.negf %101 : vector<2x128xf32>
    %103 = math.exp %102 : vector<2x128xf32>
    %cst_26 = arith.constant 1.000000e+00 : f32
    %104 = vector.broadcast %cst_26 : f32 to vector<2x128xf32>
    %105 = arith.addf %104, %103 : vector<2x128xf32>
    %106 = arith.divf %104, %105 : vector<2x128xf32>
    %107 = math.tanh %101 : vector<2x128xf32>
    %108 = vector.extract_strided_slice %106 {offsets = [0, 0], sizes = [2, 32], strides = [1, 1]} : vector<2x128xf32> to vector<2x32xf32>
    %109 = vector.extract_strided_slice %106 {offsets = [0, 32], sizes = [2, 32], strides = [1, 1]} : vector<2x128xf32> to vector<2x32xf32>
    %110 = vector.extract_strided_slice %106 {offsets = [0, 96], sizes = [2, 32], strides = [1, 1]} : vector<2x128xf32> to vector<2x32xf32>
    %111 = vector.extract_strided_slice %107 {offsets = [0, 64], sizes = [2, 32], strides = [1, 1]} : vector<2x128xf32> to vector<2x32xf32>
    %112 = arith.mulf %109, %95 : vector<2x32xf32>
    %113 = arith.mulf %108, %111 : vector<2x32xf32>
    %114 = arith.addf %112, %113 : vector<2x32xf32>
    %115 = math.tanh %114 : vector<2x32xf32>
    %116 = arith.mulf %110, %115 : vector<2x32xf32>
    %c6 = arith.constant 6 : index
    %c0_27 = arith.constant 0 : index
    %c0_28 = arith.constant 0 : index
    %117 = vector.load %arg1[%c6, %c0_27, %c0_28] : memref<8x2x128xf32, #tpu.memory_space<vmem>>, vector<1x2x128xf32>
    %118 = vector.shape_cast %117 : vector<1x2x128xf32> to vector<2x128xf32>
    %cst_29 = arith.constant dense<0.000000e+00> : vector<2x128xf32>
    %119 = tpu.matmul %116, %0, %cst_29 {dimension_numbers = #tpu.dot_dimension_numbers<[1], [0], [0], [1], [0, 0, 1, 1], [], []>} : vector<2x32xf32>, vector<32x128xf32>, vector<2x128xf32> -> vector<2x128xf32>
    %120 = arith.addf %118, %119 : vector<2x128xf32>
    %121 = arith.negf %120 : vector<2x128xf32>
    %122 = math.exp %121 : vector<2x128xf32>
    %cst_30 = arith.constant 1.000000e+00 : f32
    %123 = vector.broadcast %cst_30 : f32 to vector<2x128xf32>
    %124 = arith.addf %123, %122 : vector<2x128xf32>
    %125 = arith.divf %123, %124 : vector<2x128xf32>
    %126 = math.tanh %120 : vector<2x128xf32>
    %127 = vector.extract_strided_slice %125 {offsets = [0, 0], sizes = [2, 32], strides = [1, 1]} : vector<2x128xf32> to vector<2x32xf32>
    %128 = vector.extract_strided_slice %125 {offsets = [0, 32], sizes = [2, 32], strides = [1, 1]} : vector<2x128xf32> to vector<2x32xf32>
    %129 = vector.extract_strided_slice %125 {offsets = [0, 96], sizes = [2, 32], strides = [1, 1]} : vector<2x128xf32> to vector<2x32xf32>
    %130 = vector.extract_strided_slice %126 {offsets = [0, 64], sizes = [2, 32], strides = [1, 1]} : vector<2x128xf32> to vector<2x32xf32>
    %131 = arith.mulf %128, %114 : vector<2x32xf32>
    %132 = arith.mulf %127, %130 : vector<2x32xf32>
    %133 = arith.addf %131, %132 : vector<2x32xf32>
    %134 = math.tanh %133 : vector<2x32xf32>
    %135 = arith.mulf %129, %134 : vector<2x32xf32>
    %c7 = arith.constant 7 : index
    %c0_31 = arith.constant 0 : index
    %c0_32 = arith.constant 0 : index
    %136 = vector.load %arg1[%c7, %c0_31, %c0_32] : memref<8x2x128xf32, #tpu.memory_space<vmem>>, vector<1x2x128xf32>
    %137 = vector.shape_cast %136 : vector<1x2x128xf32> to vector<2x128xf32>
    %cst_33 = arith.constant dense<0.000000e+00> : vector<2x128xf32>
    %138 = tpu.matmul %135, %0, %cst_33 {dimension_numbers = #tpu.dot_dimension_numbers<[1], [0], [0], [1], [0, 0, 1, 1], [], []>} : vector<2x32xf32>, vector<32x128xf32>, vector<2x128xf32> -> vector<2x128xf32>
    %139 = arith.addf %137, %138 : vector<2x128xf32>
    %140 = arith.negf %139 : vector<2x128xf32>
    %141 = math.exp %140 : vector<2x128xf32>
    %cst_34 = arith.constant 1.000000e+00 : f32
    %142 = vector.broadcast %cst_34 : f32 to vector<2x128xf32>
    %143 = arith.addf %142, %141 : vector<2x128xf32>
    %144 = arith.divf %142, %143 : vector<2x128xf32>
    %145 = math.tanh %139 : vector<2x128xf32>
    %146 = vector.extract_strided_slice %144 {offsets = [0, 0], sizes = [2, 32], strides = [1, 1]} : vector<2x128xf32> to vector<2x32xf32>
    %147 = vector.extract_strided_slice %144 {offsets = [0, 32], sizes = [2, 32], strides = [1, 1]} : vector<2x128xf32> to vector<2x32xf32>
    %148 = vector.extract_strided_slice %144 {offsets = [0, 96], sizes = [2, 32], strides = [1, 1]} : vector<2x128xf32> to vector<2x32xf32>
    %149 = vector.extract_strided_slice %145 {offsets = [0, 64], sizes = [2, 32], strides = [1, 1]} : vector<2x128xf32> to vector<2x32xf32>
    %150 = arith.mulf %147, %133 : vector<2x32xf32>
    %151 = arith.mulf %146, %149 : vector<2x32xf32>
    %152 = arith.addf %150, %151 : vector<2x32xf32>
    %153 = math.tanh %152 : vector<2x32xf32>
    %154 = arith.mulf %148, %153 : vector<2x32xf32>
    %155 = tpu.concatenate %21, %40, %59, %78, %97, %116, %135, %154 in 0 : vector<2x32xf32>, vector<2x32xf32>, vector<2x32xf32>, vector<2x32xf32>, vector<2x32xf32>, vector<2x32xf32>, vector<2x32xf32>, vector<2x32xf32> -> vector<16x32xf32>
    %c0_35 = arith.constant 0 : index
    %c0_36 = arith.constant 0 : index
    %156 = vector.load %arg4[%c0_35, %c0_36] : memref<32x128xf32, #tpu.memory_space<vmem>>, vector<32x128xf32>
    %cst_37 = arith.constant dense<0.000000e+00> : vector<16x128xf32>
    %157 = tpu.matmul %155, %156, %cst_37 {dimension_numbers = #tpu.dot_dimension_numbers<[1], [0], [0], [1], [0, 0, 1, 1], [], []>} : vector<16x32xf32>, vector<32x128xf32>, vector<16x128xf32> -> vector<16x128xf32>
    %c0_38 = arith.constant 0 : index
    %c0_39 = arith.constant 0 : index
    %158 = vector.load %arg5[%c0_38, %c0_39] : memref<1x128xf32, #tpu.memory_space<vmem>>, vector<1x128xf32>
    %159 = vector.broadcast %158 : vector<1x128xf32> to vector<16x128xf32>
    %160 = arith.addf %157, %159 : vector<16x128xf32>
    %c0_40 = arith.constant 0 : index
    %c0_41 = arith.constant 0 : index
    %161 = vector.load %arg3[%c0_40, %c0_41] : memref<32x128xf32, #tpu.memory_space<vmem>>, vector<32x128xf32>
    %cst_42 = arith.constant 0.000000e+00 : f32
    %162 = vector.broadcast %cst_42 : f32 to vector<2x32xf32>
    %cst_43 = arith.constant 0.000000e+00 : f32
    %163 = vector.broadcast %cst_43 : f32 to vector<2x32xf32>
    %cst_44 = arith.constant 0.000000e+00 : f32
    %164 = vector.broadcast %cst_44 : f32 to vector<2x32xf32>
    %165 = vector.extract_strided_slice %160 {offsets = [0, 0], sizes = [2, 128], strides = [1, 1]} : vector<16x128xf32> to vector<2x128xf32>
    %cst_45 = arith.constant dense<0.000000e+00> : vector<2x128xf32>
    %166 = tpu.matmul %162, %161, %cst_45 {dimension_numbers = #tpu.dot_dimension_numbers<[1], [0], [0], [1], [0, 0, 1, 1], [], []>} : vector<2x32xf32>, vector<32x128xf32>, vector<2x128xf32> -> vector<2x128xf32>
    %167 = arith.addf %165, %166 : vector<2x128xf32>
    %168 = arith.negf %167 : vector<2x128xf32>
    %169 = math.exp %168 : vector<2x128xf32>
    %cst_46 = arith.constant 1.000000e+00 : f32
    %170 = vector.broadcast %cst_46 : f32 to vector<2x128xf32>
    %171 = arith.addf %170, %169 : vector<2x128xf32>
    %172 = arith.divf %170, %171 : vector<2x128xf32>
    %173 = math.tanh %167 : vector<2x128xf32>
    %174 = vector.extract_strided_slice %172 {offsets = [0, 0], sizes = [2, 32], strides = [1, 1]} : vector<2x128xf32> to vector<2x32xf32>
    %175 = vector.extract_strided_slice %172 {offsets = [0, 32], sizes = [2, 32], strides = [1, 1]} : vector<2x128xf32> to vector<2x32xf32>
    %176 = vector.extract_strided_slice %172 {offsets = [0, 96], sizes = [2, 32], strides = [1, 1]} : vector<2x128xf32> to vector<2x32xf32>
    %177 = vector.extract_strided_slice %173 {offsets = [0, 64], sizes = [2, 32], strides = [1, 1]} : vector<2x128xf32> to vector<2x32xf32>
    %178 = arith.mulf %175, %163 : vector<2x32xf32>
    %179 = arith.mulf %174, %177 : vector<2x32xf32>
    %180 = arith.addf %178, %179 : vector<2x32xf32>
    %181 = math.tanh %180 : vector<2x32xf32>
    %182 = arith.mulf %176, %181 : vector<2x32xf32>
    %183 = arith.addf %164, %182 : vector<2x32xf32>
    %184 = vector.extract_strided_slice %160 {offsets = [2, 0], sizes = [2, 128], strides = [1, 1]} : vector<16x128xf32> to vector<2x128xf32>
    %cst_47 = arith.constant dense<0.000000e+00> : vector<2x128xf32>
    %185 = tpu.matmul %182, %161, %cst_47 {dimension_numbers = #tpu.dot_dimension_numbers<[1], [0], [0], [1], [0, 0, 1, 1], [], []>} : vector<2x32xf32>, vector<32x128xf32>, vector<2x128xf32> -> vector<2x128xf32>
    %186 = arith.addf %184, %185 : vector<2x128xf32>
    %187 = arith.negf %186 : vector<2x128xf32>
    %188 = math.exp %187 : vector<2x128xf32>
    %cst_48 = arith.constant 1.000000e+00 : f32
    %189 = vector.broadcast %cst_48 : f32 to vector<2x128xf32>
    %190 = arith.addf %189, %188 : vector<2x128xf32>
    %191 = arith.divf %189, %190 : vector<2x128xf32>
    %192 = math.tanh %186 : vector<2x128xf32>
    %193 = vector.extract_strided_slice %191 {offsets = [0, 0], sizes = [2, 32], strides = [1, 1]} : vector<2x128xf32> to vector<2x32xf32>
    %194 = vector.extract_strided_slice %191 {offsets = [0, 32], sizes = [2, 32], strides = [1, 1]} : vector<2x128xf32> to vector<2x32xf32>
    %195 = vector.extract_strided_slice %191 {offsets = [0, 96], sizes = [2, 32], strides = [1, 1]} : vector<2x128xf32> to vector<2x32xf32>
    %196 = vector.extract_strided_slice %192 {offsets = [0, 64], sizes = [2, 32], strides = [1, 1]} : vector<2x128xf32> to vector<2x32xf32>
    %197 = arith.mulf %194, %180 : vector<2x32xf32>
    %198 = arith.mulf %193, %196 : vector<2x32xf32>
    %199 = arith.addf %197, %198 : vector<2x32xf32>
    %200 = math.tanh %199 : vector<2x32xf32>
    %201 = arith.mulf %195, %200 : vector<2x32xf32>
    %202 = arith.addf %183, %201 : vector<2x32xf32>
    %203 = vector.extract_strided_slice %160 {offsets = [4, 0], sizes = [2, 128], strides = [1, 1]} : vector<16x128xf32> to vector<2x128xf32>
    %cst_49 = arith.constant dense<0.000000e+00> : vector<2x128xf32>
    %204 = tpu.matmul %201, %161, %cst_49 {dimension_numbers = #tpu.dot_dimension_numbers<[1], [0], [0], [1], [0, 0, 1, 1], [], []>} : vector<2x32xf32>, vector<32x128xf32>, vector<2x128xf32> -> vector<2x128xf32>
    %205 = arith.addf %203, %204 : vector<2x128xf32>
    %206 = arith.negf %205 : vector<2x128xf32>
    %207 = math.exp %206 : vector<2x128xf32>
    %cst_50 = arith.constant 1.000000e+00 : f32
    %208 = vector.broadcast %cst_50 : f32 to vector<2x128xf32>
    %209 = arith.addf %208, %207 : vector<2x128xf32>
    %210 = arith.divf %208, %209 : vector<2x128xf32>
    %211 = math.tanh %205 : vector<2x128xf32>
    %212 = vector.extract_strided_slice %210 {offsets = [0, 0], sizes = [2, 32], strides = [1, 1]} : vector<2x128xf32> to vector<2x32xf32>
    %213 = vector.extract_strided_slice %210 {offsets = [0, 32], sizes = [2, 32], strides = [1, 1]} : vector<2x128xf32> to vector<2x32xf32>
    %214 = vector.extract_strided_slice %210 {offsets = [0, 96], sizes = [2, 32], strides = [1, 1]} : vector<2x128xf32> to vector<2x32xf32>
    %215 = vector.extract_strided_slice %211 {offsets = [0, 64], sizes = [2, 32], strides = [1, 1]} : vector<2x128xf32> to vector<2x32xf32>
    %216 = arith.mulf %213, %199 : vector<2x32xf32>
    %217 = arith.mulf %212, %215 : vector<2x32xf32>
    %218 = arith.addf %216, %217 : vector<2x32xf32>
    %219 = math.tanh %218 : vector<2x32xf32>
    %220 = arith.mulf %214, %219 : vector<2x32xf32>
    %221 = arith.addf %202, %220 : vector<2x32xf32>
    %222 = vector.extract_strided_slice %160 {offsets = [6, 0], sizes = [2, 128], strides = [1, 1]} : vector<16x128xf32> to vector<2x128xf32>
    %cst_51 = arith.constant dense<0.000000e+00> : vector<2x128xf32>
    %223 = tpu.matmul %220, %161, %cst_51 {dimension_numbers = #tpu.dot_dimension_numbers<[1], [0], [0], [1], [0, 0, 1, 1], [], []>} : vector<2x32xf32>, vector<32x128xf32>, vector<2x128xf32> -> vector<2x128xf32>
    %224 = arith.addf %222, %223 : vector<2x128xf32>
    %225 = arith.negf %224 : vector<2x128xf32>
    %226 = math.exp %225 : vector<2x128xf32>
    %cst_52 = arith.constant 1.000000e+00 : f32
    %227 = vector.broadcast %cst_52 : f32 to vector<2x128xf32>
    %228 = arith.addf %227, %226 : vector<2x128xf32>
    %229 = arith.divf %227, %228 : vector<2x128xf32>
    %230 = math.tanh %224 : vector<2x128xf32>
    %231 = vector.extract_strided_slice %229 {offsets = [0, 0], sizes = [2, 32], strides = [1, 1]} : vector<2x128xf32> to vector<2x32xf32>
    %232 = vector.extract_strided_slice %229 {offsets = [0, 32], sizes = [2, 32], strides = [1, 1]} : vector<2x128xf32> to vector<2x32xf32>
    %233 = vector.extract_strided_slice %229 {offsets = [0, 96], sizes = [2, 32], strides = [1, 1]} : vector<2x128xf32> to vector<2x32xf32>
    %234 = vector.extract_strided_slice %230 {offsets = [0, 64], sizes = [2, 32], strides = [1, 1]} : vector<2x128xf32> to vector<2x32xf32>
    %235 = arith.mulf %232, %218 : vector<2x32xf32>
    %236 = arith.mulf %231, %234 : vector<2x32xf32>
    %237 = arith.addf %235, %236 : vector<2x32xf32>
    %238 = math.tanh %237 : vector<2x32xf32>
    %239 = arith.mulf %233, %238 : vector<2x32xf32>
    %240 = arith.addf %221, %239 : vector<2x32xf32>
    %241 = vector.extract_strided_slice %160 {offsets = [8, 0], sizes = [2, 128], strides = [1, 1]} : vector<16x128xf32> to vector<2x128xf32>
    %cst_53 = arith.constant dense<0.000000e+00> : vector<2x128xf32>
    %242 = tpu.matmul %239, %161, %cst_53 {dimension_numbers = #tpu.dot_dimension_numbers<[1], [0], [0], [1], [0, 0, 1, 1], [], []>} : vector<2x32xf32>, vector<32x128xf32>, vector<2x128xf32> -> vector<2x128xf32>
    %243 = arith.addf %241, %242 : vector<2x128xf32>
    %244 = arith.negf %243 : vector<2x128xf32>
    %245 = math.exp %244 : vector<2x128xf32>
    %cst_54 = arith.constant 1.000000e+00 : f32
    %246 = vector.broadcast %cst_54 : f32 to vector<2x128xf32>
    %247 = arith.addf %246, %245 : vector<2x128xf32>
    %248 = arith.divf %246, %247 : vector<2x128xf32>
    %249 = math.tanh %243 : vector<2x128xf32>
    %250 = vector.extract_strided_slice %248 {offsets = [0, 0], sizes = [2, 32], strides = [1, 1]} : vector<2x128xf32> to vector<2x32xf32>
    %251 = vector.extract_strided_slice %248 {offsets = [0, 32], sizes = [2, 32], strides = [1, 1]} : vector<2x128xf32> to vector<2x32xf32>
    %252 = vector.extract_strided_slice %248 {offsets = [0, 96], sizes = [2, 32], strides = [1, 1]} : vector<2x128xf32> to vector<2x32xf32>
    %253 = vector.extract_strided_slice %249 {offsets = [0, 64], sizes = [2, 32], strides = [1, 1]} : vector<2x128xf32> to vector<2x32xf32>
    %254 = arith.mulf %251, %237 : vector<2x32xf32>
    %255 = arith.mulf %250, %253 : vector<2x32xf32>
    %256 = arith.addf %254, %255 : vector<2x32xf32>
    %257 = math.tanh %256 : vector<2x32xf32>
    %258 = arith.mulf %252, %257 : vector<2x32xf32>
    %259 = arith.addf %240, %258 : vector<2x32xf32>
    %260 = vector.extract_strided_slice %160 {offsets = [10, 0], sizes = [2, 128], strides = [1, 1]} : vector<16x128xf32> to vector<2x128xf32>
    %cst_55 = arith.constant dense<0.000000e+00> : vector<2x128xf32>
    %261 = tpu.matmul %258, %161, %cst_55 {dimension_numbers = #tpu.dot_dimension_numbers<[1], [0], [0], [1], [0, 0, 1, 1], [], []>} : vector<2x32xf32>, vector<32x128xf32>, vector<2x128xf32> -> vector<2x128xf32>
    %262 = arith.addf %260, %261 : vector<2x128xf32>
    %263 = arith.negf %262 : vector<2x128xf32>
    %264 = math.exp %263 : vector<2x128xf32>
    %cst_56 = arith.constant 1.000000e+00 : f32
    %265 = vector.broadcast %cst_56 : f32 to vector<2x128xf32>
    %266 = arith.addf %265, %264 : vector<2x128xf32>
    %267 = arith.divf %265, %266 : vector<2x128xf32>
    %268 = math.tanh %262 : vector<2x128xf32>
    %269 = vector.extract_strided_slice %267 {offsets = [0, 0], sizes = [2, 32], strides = [1, 1]} : vector<2x128xf32> to vector<2x32xf32>
    %270 = vector.extract_strided_slice %267 {offsets = [0, 32], sizes = [2, 32], strides = [1, 1]} : vector<2x128xf32> to vector<2x32xf32>
    %271 = vector.extract_strided_slice %267 {offsets = [0, 96], sizes = [2, 32], strides = [1, 1]} : vector<2x128xf32> to vector<2x32xf32>
    %272 = vector.extract_strided_slice %268 {offsets = [0, 64], sizes = [2, 32], strides = [1, 1]} : vector<2x128xf32> to vector<2x32xf32>
    %273 = arith.mulf %270, %256 : vector<2x32xf32>
    %274 = arith.mulf %269, %272 : vector<2x32xf32>
    %275 = arith.addf %273, %274 : vector<2x32xf32>
    %276 = math.tanh %275 : vector<2x32xf32>
    %277 = arith.mulf %271, %276 : vector<2x32xf32>
    %278 = arith.addf %259, %277 : vector<2x32xf32>
    %279 = vector.extract_strided_slice %160 {offsets = [12, 0], sizes = [2, 128], strides = [1, 1]} : vector<16x128xf32> to vector<2x128xf32>
    %cst_57 = arith.constant dense<0.000000e+00> : vector<2x128xf32>
    %280 = tpu.matmul %277, %161, %cst_57 {dimension_numbers = #tpu.dot_dimension_numbers<[1], [0], [0], [1], [0, 0, 1, 1], [], []>} : vector<2x32xf32>, vector<32x128xf32>, vector<2x128xf32> -> vector<2x128xf32>
    %281 = arith.addf %279, %280 : vector<2x128xf32>
    %282 = arith.negf %281 : vector<2x128xf32>
    %283 = math.exp %282 : vector<2x128xf32>
    %cst_58 = arith.constant 1.000000e+00 : f32
    %284 = vector.broadcast %cst_58 : f32 to vector<2x128xf32>
    %285 = arith.addf %284, %283 : vector<2x128xf32>
    %286 = arith.divf %284, %285 : vector<2x128xf32>
    %287 = math.tanh %281 : vector<2x128xf32>
    %288 = vector.extract_strided_slice %286 {offsets = [0, 0], sizes = [2, 32], strides = [1, 1]} : vector<2x128xf32> to vector<2x32xf32>
    %289 = vector.extract_strided_slice %286 {offsets = [0, 32], sizes = [2, 32], strides = [1, 1]} : vector<2x128xf32> to vector<2x32xf32>
    %290 = vector.extract_strided_slice %286 {offsets = [0, 96], sizes = [2, 32], strides = [1, 1]} : vector<2x128xf32> to vector<2x32xf32>
    %291 = vector.extract_strided_slice %287 {offsets = [0, 64], sizes = [2, 32], strides = [1, 1]} : vector<2x128xf32> to vector<2x32xf32>
    %292 = arith.mulf %289, %275 : vector<2x32xf32>
    %293 = arith.mulf %288, %291 : vector<2x32xf32>
    %294 = arith.addf %292, %293 : vector<2x32xf32>
    %295 = math.tanh %294 : vector<2x32xf32>
    %296 = arith.mulf %290, %295 : vector<2x32xf32>
    %297 = arith.addf %278, %296 : vector<2x32xf32>
    %298 = vector.extract_strided_slice %160 {offsets = [14, 0], sizes = [2, 128], strides = [1, 1]} : vector<16x128xf32> to vector<2x128xf32>
    %cst_59 = arith.constant dense<0.000000e+00> : vector<2x128xf32>
    %299 = tpu.matmul %296, %161, %cst_59 {dimension_numbers = #tpu.dot_dimension_numbers<[1], [0], [0], [1], [0, 0, 1, 1], [], []>} : vector<2x32xf32>, vector<32x128xf32>, vector<2x128xf32> -> vector<2x128xf32>
    %300 = arith.addf %298, %299 : vector<2x128xf32>
    %301 = arith.negf %300 : vector<2x128xf32>
    %302 = math.exp %301 : vector<2x128xf32>
    %cst_60 = arith.constant 1.000000e+00 : f32
    %303 = vector.broadcast %cst_60 : f32 to vector<2x128xf32>
    %304 = arith.addf %303, %302 : vector<2x128xf32>
    %305 = arith.divf %303, %304 : vector<2x128xf32>
    %306 = math.tanh %300 : vector<2x128xf32>
    %307 = vector.extract_strided_slice %305 {offsets = [0, 0], sizes = [2, 32], strides = [1, 1]} : vector<2x128xf32> to vector<2x32xf32>
    %308 = vector.extract_strided_slice %305 {offsets = [0, 32], sizes = [2, 32], strides = [1, 1]} : vector<2x128xf32> to vector<2x32xf32>
    %309 = vector.extract_strided_slice %305 {offsets = [0, 96], sizes = [2, 32], strides = [1, 1]} : vector<2x128xf32> to vector<2x32xf32>
    %310 = vector.extract_strided_slice %306 {offsets = [0, 64], sizes = [2, 32], strides = [1, 1]} : vector<2x128xf32> to vector<2x32xf32>
    %311 = arith.mulf %308, %294 : vector<2x32xf32>
    %312 = arith.mulf %307, %310 : vector<2x32xf32>
    %313 = arith.addf %311, %312 : vector<2x32xf32>
    %314 = math.tanh %313 : vector<2x32xf32>
    %315 = arith.mulf %309, %314 : vector<2x32xf32>
    %316 = arith.addf %297, %315 : vector<2x32xf32>
    %c0_61 = arith.constant 0 : index
    %c0_62 = arith.constant 0 : index
    %317 = vector.load %arg6[%c0_61, %c0_62] : memref<32x32xf32, #tpu.memory_space<vmem>>, vector<32x32xf32>
    %cst_63 = arith.constant dense<0.000000e+00> : vector<2x32xf32>
    %318 = tpu.matmul %315, %317, %cst_63 {dimension_numbers = #tpu.dot_dimension_numbers<[1], [0], [0], [1], [0, 0, 1, 1], [], []>} : vector<2x32xf32>, vector<32x32xf32>, vector<2x32xf32> -> vector<2x32xf32>
    %c0_64 = arith.constant 0 : index
    %c0_65 = arith.constant 0 : index
    %319 = vector.load %arg7[%c0_64, %c0_65] : memref<1x32xf32, #tpu.memory_space<vmem>>, vector<1x32xf32>
    %320 = vector.broadcast %319 : vector<1x32xf32> to vector<2x32xf32>
    %321 = arith.addf %318, %320 : vector<2x32xf32>
    %cst_66 = arith.constant 0.000000e+00 : f32
    %322 = vector.broadcast %cst_66 : f32 to vector<2x32xf32>
    %323 = arith.cmpf oge, %316, %322 : vector<2x32xf32>
    %cst_67 = arith.constant 0.00999999977 : f32
    %324 = vector.broadcast %cst_67 : f32 to vector<2x32xf32>
    %325 = arith.mulf %324, %316 : vector<2x32xf32>
    %326 = arith.select %323, %316, %325 : vector<2x32xi1>, vector<2x32xf32>
    %cst_68 = arith.constant 0.000000e+00 : f32
    %327 = vector.broadcast %cst_68 : f32 to vector<2x32xf32>
    %328 = arith.cmpf oge, %321, %327 : vector<2x32xf32>
    %cst_69 = arith.constant 0.00999999977 : f32
    %329 = vector.broadcast %cst_69 : f32 to vector<2x32xf32>
    %330 = arith.mulf %329, %321 : vector<2x32xf32>
    %331 = arith.select %328, %321, %330 : vector<2x32xi1>, vector<2x32xf32>
    %c0_70 = arith.constant 0 : index
    %c0_71 = arith.constant 0 : index
    %332 = vector.load %arg8[%c0_70, %c0_71] : memref<32x3xf32, #tpu.memory_space<vmem>>, vector<32x3xf32>
    %cst_72 = arith.constant dense<0.000000e+00> : vector<2x3xf32>
    %333 = tpu.matmul %326, %332, %cst_72 {dimension_numbers = #tpu.dot_dimension_numbers<[1], [0], [0], [1], [0, 0, 1, 1], [], []>} : vector<2x32xf32>, vector<32x3xf32>, vector<2x3xf32> -> vector<2x3xf32>
    %c0_73 = arith.constant 0 : index
    %c0_74 = arith.constant 0 : index
    %334 = vector.load %arg9[%c0_73, %c0_74] : memref<32x3xf32, #tpu.memory_space<vmem>>, vector<32x3xf32>
    %cst_75 = arith.constant dense<0.000000e+00> : vector<2x3xf32>
    %335 = tpu.matmul %331, %334, %cst_75 {dimension_numbers = #tpu.dot_dimension_numbers<[1], [0], [0], [1], [0, 0, 1, 1], [], []>} : vector<2x32xf32>, vector<32x3xf32>, vector<2x3xf32> -> vector<2x3xf32>
    %336 = arith.addf %333, %335 : vector<2x3xf32>
    %c0_76 = arith.constant 0 : index
    %c0_77 = arith.constant 0 : index
    %337 = vector.load %arg10[%c0_76, %c0_77] : memref<1x3xf32, #tpu.memory_space<vmem>>, vector<1x3xf32>
    %338 = vector.broadcast %337 : vector<1x3xf32> to vector<2x3xf32>
    %339 = arith.addf %336, %338 : vector<2x3xf32>
    %c0_78 = arith.constant 0 : index
    %c0_79 = arith.constant 0 : index
    %340 = vector.load %arg11[%c0_78, %c0_79] : memref<2x3xf32, #tpu.memory_space<vmem>>, vector<2x3xf32>
    tpu.vector_store %arg11[%c0_78, %c0_79], %339 {strides = array<i32>} : memref<2x3xf32, #tpu.memory_space<vmem>>, vector<2x3xf32>,
    return
  }
  func.func @transform_0(%arg0: i32) -> (i32, i32, i32) {
    %c0_i32 = arith.constant 0 : i32
    %c0_i32_0 = arith.constant 0 : i32
    %c0_i32_1 = arith.constant 0 : i32
    return %c0_i32, %arg0, %c0_i32_0 : i32, i32, i32
  }
  func.func @transform_1(%arg0: i32) -> (i32, i32) {
    %c0_i32 = arith.constant 0 : i32
    %c0_i32_0 = arith.constant 0 : i32
    %c0_i32_1 = arith.constant 0 : i32
    return %c0_i32, %c0_i32_0 : i32, i32
  }
  func.func @transform_2(%arg0: i32) -> (i32, i32) {
    %c0_i32 = arith.constant 0 : i32
    %c0_i32_0 = arith.constant 0 : i32
    %c0_i32_1 = arith.constant 0 : i32
    return %c0_i32, %c0_i32_0 : i32, i32
  }
  func.func @transform_3(%arg0: i32) -> (i32, i32) {
    %c0_i32 = arith.constant 0 : i32
    %c0_i32_0 = arith.constant 0 : i32
    %c0_i32_1 = arith.constant 0 : i32
    return %c0_i32, %c0_i32_0 : i32, i32
  }
  func.func @transform_4(%arg0: i32) -> (i32, i32) {
    %c0_i32 = arith.constant 0 : i32
    %c0_i32_0 = arith.constant 0 : i32
    %c0_i32_1 = arith.constant 0 : i32
    return %c0_i32, %c0_i32_0 : i32, i32
  }
  func.func @transform_5(%arg0: i32) -> (i32, i32) {
    %c0_i32 = arith.constant 0 : i32
    %c0_i32_0 = arith.constant 0 : i32
    %c0_i32_1 = arith.constant 0 : i32
    return %c0_i32, %c0_i32_0 : i32, i32
  }
  func.func @transform_6(%arg0: i32) -> (i32, i32) {
    %c0_i32 = arith.constant 0 : i32
    %c0_i32_0 = arith.constant 0 : i32
    %c0_i32_1 = arith.constant 0 : i32
    return %c0_i32, %c0_i32_0 : i32, i32
  }
  func.func @transform_7(%arg0: i32) -> (i32, i32) {
    %c0_i32 = arith.constant 0 : i32
    %c0_i32_0 = arith.constant 0 : i32
    %c0_i32_1 = arith.constant 0 : i32
    return %c0_i32, %c0_i32_0 : i32, i32
  }
  func.func @transform_8(%arg0: i32) -> (i32, i32) {
    %c0_i32 = arith.constant 0 : i32
    %c0_i32_0 = arith.constant 0 : i32
    %c0_i32_1 = arith.constant 0 : i32
    return %c0_i32, %c0_i32_0 : i32, i32
  }
  func.func @transform_9(%arg0: i32) -> (i32, i32) {
    %c0_i32 = arith.constant 0 : i32
    %c0_i32_0 = arith.constant 0 : i32
    %c0_i32_1 = arith.constant 0 : i32
    return %c0_i32, %c0_i32_0 : i32, i32
  }
  func.func @transform_10(%arg0: i32) -> (i32, i32) {
    %c0_i32 = arith.constant 0 : i32
    %c0_i32_0 = arith.constant 0 : i32
    return %arg0, %c0_i32 : i32, i32
  }
}

</mosaic_0001>

<bundles_post_ra>
// kernel: tpu_custom_call.1
= control target key start
LH: loop header
LB: loop body
LE: loop exit
PB: predicated region body
PF: predicated region fallthrough
CT: control target
= control target key end

     0   :  { %15 = vsyncpa [#allocation3], 0  ;;  %s3183_s0 = inlined_call_operand.hbm [shape: f32[8,2,128], index: 0, kind: input, shape index: {}]   ;;  %s3184_s1 = inlined_call_operand.vmem [shape: f32[32,128], index: 1, kind: input, shape index: {}]   ;;  %s3185_s2 = inlined_call_operand.vmem [shape: f32[32,128], index: 2, kind: input, shape index: {}]   ;;  %s3186_s3 = inlined_call_operand.hbm [shape: f32[32,128], index: 3, kind: input, shape index: {}]   ;;  %s3187_s4 = inlined_call_operand.vmem [shape: f32[1,128], index: 4, kind: input, shape index: {}]   ;;  %s3188_s5 = inlined_call_operand.hbm [shape: f32[32,32], index: 5, kind: input, shape index: {}]   ;;  %s3189_s6 = inlined_call_operand.vmem [shape: f32[1,32], index: 6, kind: input, shape index: {}]   ;;  %s3190_s7 = inlined_call_operand.vmem [shape: f32[32,3], index: 7, kind: input, shape index: {}]   ;;  %s3191_s8 = inlined_call_operand.vmem [shape: f32[32,3], index: 8, kind: input, shape index: {}]   ;;  %s3192_s9 = inlined_call_operand.vmem [shape: f32[1,3], index: 9, kind: input, shape index: {}]   ;;  %s3193_s10 = inlined_call_operand.hbm [shape: f32[2,3], index: 10, kind: output, shape index: {}]  }
   0x1   :  { %16 = vsyncpa [#allocation6], 0 }
   0x2   :  { %17 = vsyncpa [#allocation4], 0  ;;  %s2729_s13 = smov [#allocation5]  }
   0x3   :  { %s39_s14 = sshll.u32 %s2729_s13, 4  ;;  %s40_s14 = int_to_ptr.vmem [resolvable:$true] %s39_s14 }
   0x4   :  { %s2651_s15 = scalar_lea.vmem %s40_s14, 512  ;;  %p2656_p1 = scmp.lt.s32.totalorder %s40_s14, %s40_s14 }
   0x5   :  { %p2652_p0 = scmp.ne.s32.totalorder %s40_s14, %s2651_s15  ;;  %p2657_p2 = scmp.lt.s32.totalorder %s2651_s15, %s2651_s15 }
   0x7   :  { %p2658_p3 = por %p2657_p2, %p2656_p1 }
   0x9   :  { %p2659_p4 = pnand %p2658_p3, %p2652_p0 }
   0xb   :  { %2662 = shalt.err (!%p2659_p4)
}
   0xc   :  { %s2730_s16 = smov 128   ;;  %s2731_s17 = smov 8  }
   0xd   :  { %45 = dma.hbm_to_vmem [thread:$0]  %s3186_s3, 512, %s40_s14, [#allocation6], %s2730_s16, %s2730_s16, %s2731_s17  }
   0xe   :  { %s2732_s20 = smov [#allocation2]  }
   0xf   :  { %s23_s21 = sshll.u32 %s2732_s20, 4  ;;  %s24_s21 = int_to_ptr.vmem [resolvable:$true] %s23_s21 }
  0x10   :  { %s2671_s22 = scalar_lea.vmem %s24_s21, 256  ;;  %p2676_p6 = scmp.lt.s32.totalorder %s24_s21, %s24_s21 }
  0x11   :  { %p2672_p5 = scmp.ne.s32.totalorder %s24_s21, %s2671_s22  ;;  %p2677_p7 = scmp.lt.s32.totalorder %s2671_s22, %s2671_s22 }
  0x13   :  { %p2678_p8 = por %p2677_p7, %p2676_p6 }
  0x15   :  { %p2679_p9 = pnand %p2678_p8, %p2672_p5 }
  0x17   :  { %2682 = shalt.err (!%p2679_p9)
}
  0x18   :  { %s2733_s23 = smov 32   ;;  %s2734_s24 = smov 2  }
  0x19   :  { %29 = dma.hbm_to_vmem [thread:$0]  %s3183_s0, 256, %s24_s21, [#allocation3], %s2733_s23, %s2733_s23, %s2734_s24  }
  0x1a   :  { %s2735_s27 = smov [#allocation7]  }
  0x1b   :  { %s53_s3 = sshll.u32 %s2735_s27, 4  ;;  %s54_s3 = int_to_ptr.vmem [resolvable:$true] %s53_s3 }
  0x1c   :  { %s2691_s28 = scalar_lea.vmem %s54_s3, 512  ;;  %p2696_p11 = scmp.lt.s32.totalorder %s54_s3, %s54_s3 }
  0x1d   :  { %p2692_p10 = scmp.ne.s32.totalorder %s54_s3, %s2691_s28  ;;  %p2697_p12 = scmp.lt.s32.totalorder %s2691_s28, %s2691_s28 }
  0x1f   :  { %p2698_p13 = por %p2697_p12, %p2696_p11 }
  0x21   :  { %p2699_p0 = pnand %p2698_p13, %p2692_p10 }
  0x23   :  { %2702 = shalt.err (!%p2699_p0)
}
  0x24   :  { %59 = dma.hbm_to_vmem [thread:$0]  %s3188_s5, 512, %s54_s3, [#allocation6], %s2730_s16, %s2730_s16, %s2731_s17  }
  0x25   :  { %2723 = dma.done.wait [#allocation3], 256  }
  0x26   :  { %2724 = vsyncadd [#allocation3], 4294967040 }
  0x27   :  { %2725 = dma.done.wait [#allocation6], 1024  }
  0x28   :  { %2726 = vsyncadd [#allocation6], 4294966272  ;;  %v2736_v0 = vmov 0.0   ;;  %vm2737_vm0 = vmmov 0   ;;  %v2815_v1 = vld [vmem:[%s3184_s1 + $0x18] sm:$0xff]  ;;  %v2820_v2 = vld [vmem:[%s3184_s1 + $0x10] sm:$0xff] }
  0x29   :  { %2284 = vmatprep.subr.mxu0 %v2736_v0  ;;  %2292 = vmatprep.mubr.msk.f32.mxu0 %vm2737_vm0, %v2736_v0  ;;  %v2828_v3 = vld [vmem:[%s3184_s1 + $0x8] sm:$0xff]  ;;  %v2837_v4 = vld [vmem:[%s3184_s1] sm:$0xff]  ;;  %s2738_s1 = smov 64   ;;  %vm82_vm1 = vcmask 261120   ;;  %vm908_vm2 = vcmask 1041408   ;;  %vm910_vm3 = vcmask 1043456  }
  0x2a   :  { %2295 = vmatprep.subr.mxu1 %v2736_v0  ;;  %2303 = vmatprep.mubr.msk.f32.mxu1 %vm2737_vm0, %v2736_v0  ;;  %v81_v5 = vld [vmem:[#allocation2] sm:$0x3]  ;;  %v182_v23 = vld [vmem:[#allocation2 + $0x2] sm:$0x3]  ;;  %v284_v41 = vld [vmem:[#allocation2 + $0x4] sm:$0x3] }
  0x2b   :  { %2285 = vmatpush3.msra.mxu0 %v2815_v1  ;;  %2296 = vmatpush3.msra.mxu1 %v2815_v1  ;;  %v386_v63 = vld [vmem:[#allocation2 + $0x6] sm:$0x3]  ;;  %vm912_vm4 = vcmask 1045504   ;;  %vm2127_vm7 = vcmask 17408  }
  0x2c   :  { %2286 = vmatprep.subr.mxu0 %v2736_v0  ;;  %2297 = vmatprep.subr.mxu1 %v2736_v0 }
  0x2d   :  { %2287 = vmatpush3.msra.mxu0 %v2820_v2  ;;  %2298 = vmatpush3.msra.mxu1 %v2820_v2 }
  0x2e   :  { %2288 = vmatprep.subr.mxu0 %v2736_v0  ;;  %2299 = vmatprep.subr.mxu1 %v2736_v0 }
  0x2f   :  { %2289 = vmatpush3.msra.mxu0 %v2828_v3  ;;  %2300 = vmatpush3.msra.mxu1 %v2828_v3 }
  0x30   :  { %2290 = vmatprep.subr.mxu0 %v2736_v0  ;;  %2301 = vmatprep.subr.mxu1 %v2736_v0 }
  0x31   :  { %2291 = vmatpush3.msra.mxu0 %v2837_v4  ;;  %2302 = vmatpush3.msra.mxu1 %v2837_v4 }
  0x32   :  { %2293 = vmatmul.mubr.f32.vlgmr.msra.gmra.mxu0 %v2736_v0  ;;  %2306 = vmatprep.subr.mxu0 %v2736_v0 }
  0x33   :  { %2307 = vmatpush3.msra.mxu0 %v2815_v1  ;;  %2314 = vmatprep.mubr.msk.f32.mxu0 %vm2737_vm0, %v2736_v0 }
  0x34   :  { %2308 = vmatprep.subr.mxu0 %v2736_v0  ;;  %2317 = vmatprep.subr.mxu1 %v2736_v0 }
  0x35   :  { %2309 = vmatpush3.msra.mxu0 %v2820_v2 }
  0x36   :  { %2310 = vmatprep.subr.mxu0 %v2736_v0 }
  0x37   :  { %2311 = vmatpush3.msra.mxu0 %v2828_v3 }
  0x38   :  { %2312 = vmatprep.subr.mxu0 %v2736_v0 }
  0x39   :  { %2313 = vmatpush3.msra.mxu0 %v2837_v4 }
  0x3a   :  { %2328 = vmatprep.subr.mxu0 %v2736_v0 }
  0xf2   :  { %v152_v6 = vpop.f32.mrf.mxu0 }
  0xf3   :  { %v156_v7 = vadd.f32 %v152_v6, %v81_v5 }
  0xf4   :  { %v2294_v8 = vpop.f32.mrf.mxu0 }
  0xf5   :  { %2515 = vtanh.f32 %v156_v7  ;;  %v2145_v10 = vmul.f32 -1.442695, %v156_v7 }
  0xf7   :  { %2517 = vpow2.f32 %v2145_v10 }
 0x102   :  { %v2516_v9 = vpop.eup %2515 }
 0x103   :  { %166 = vrot.lane.b32.xlu0 %v2516_v9, %s2738_s1 }
 0x104   :  { %v2518_v11 = vpop.eup %2517 }
 0x105   :  { %v160_v12 = vadd.f32 1.0, %v2518_v11 }
 0x107   :  { %2519 = vrcp.f32 %v160_v12 }
 0x114   :  { %v2520_v13 = vpop.eup %2519 }
 0x115   :  { %v164_v16 = vmul.f32 0.0, %v2520_v13 }
 0x175   :  { %v167_v14 = vpop.permute.xlu0 %166 }
 0x176   :  { %v169_v15 = vmul.f32 %v2520_v13, %v167_v14 }
 0x178   :  { %171 = vrot.lane.b32.xlu0 %v169_v15, %s2733_s23 }
 0x1ea   :  { %v172_v17 = vpop.permute.xlu0 %171 }
 0x1eb   :  { %v174_v18 = vadd.f32 %v172_v17, %v164_v16 }
 0x1ed   :  { %2521 = vtanh.f32 %v174_v18 }
 0x1fa   :  { %v2522_v19 = vpop.eup %2521 }
 0x1fb   :  { %177 = vrot.lane.b32.xlu1 %v2522_v19, %s2738_s1 }
 0x26d   :  { %v178_v20 = vpop.permute.xlu1 %177 }
 0x26e   :  { %v2862_v21 = vmul.f32 %v2520_v13, %v178_v20 }
 0x270   :  { %184 = vrot.lane.b32.xlu1 %v2862_v21, %s2733_s23 }
 0x2e2   :  { %v185_v22 = vpop.permute.xlu1 %184 }
 0x2e3   :  { %2304 = vmatmul.mubr.msk.f32.vlgmr.msra.gmra.mxu1 %vm82_vm1, %v185_v22 }
 0x2e4   :  { %2318 = vmatpush3.msra.mxu1 %v2815_v1  ;;  %2325 = vmatprep.mubr.msk.f32.mxu1 %vm2737_vm0, %v2736_v0 }
 0x2e5   :  { %2319 = vmatprep.subr.mxu1 %v2736_v0 }
 0x2e6   :  { %2320 = vmatpush3.msra.mxu1 %v2820_v2 }
 0x2e7   :  { %2321 = vmatprep.subr.mxu1 %v2736_v0 }
 0x2e8   :  { %2322 = vmatpush3.msra.mxu1 %v2828_v3 }
 0x2e9   :  { %2323 = vmatprep.subr.mxu1 %v2736_v0 }
 0x2ea   :  { %2324 = vmatpush3.msra.mxu1 %v2837_v4 }
 0x2eb   :  { %2339 = vmatprep.subr.mxu1 %v2736_v0 }
 0x3a3   :  { %v254_v24 = vpop.f32.mrf.mxu1 }
 0x3a4   :  { %v258_v25 = vadd.f32 %v254_v24, %v182_v23  ;;  %v488_v24 = vld [vmem:[#allocation2 + $0x8] sm:$0x3] }
 0x3a5   :  { %v2305_v26 = vpop.f32.mrf.mxu1 }
 0x3a6   :  { %2523 = vtanh.f32 %v258_v25  ;;  %v2147_v28 = vmul.f32 -1.442695, %v258_v25 }
 0x3a8   :  { %2525 = vpow2.f32 %v2147_v28 }
 0x3b3   :  { %v2524_v27 = vpop.eup %2523 }
 0x3b4   :  { %268 = vrot.lane.b32.xlu0 %v2524_v27, %s2738_s1 }
 0x3b5   :  { %v2526_v29 = vpop.eup %2525 }
 0x3b6   :  { %v262_v30 = vadd.f32 1.0, %v2526_v29 }
 0x3b8   :  { %2527 = vrcp.f32 %v262_v30 }
 0x3c5   :  { %v2528_v31 = vpop.eup %2527 }
 0x3c6   :  { %v266_v34 = vmul.f32 %v2528_v31, %v174_v18 }
 0x426   :  { %v269_v32 = vpop.permute.xlu0 %268 }
 0x427   :  { %v271_v33 = vmul.f32 %v2528_v31, %v269_v32 }
 0x429   :  { %273 = vrot.lane.b32.xlu1 %v271_v33, %s2733_s23 }
 0x49b   :  { %v274_v35 = vpop.permute.xlu1 %273 }
 0x49c   :  { %v276_v36 = vadd.f32 %v274_v35, %v266_v34 }
 0x49e   :  { %2529 = vtanh.f32 %v276_v36 }
 0x4ab   :  { %v2530_v37 = vpop.eup %2529 }
 0x4ac   :  { %279 = vrot.lane.b32.xlu0 %v2530_v37, %s2738_s1 }
 0x51e   :  { %v280_v38 = vpop.permute.xlu0 %279 }
 0x51f   :  { %v282_v39 = vmul.f32 %v2528_v31, %v280_v38 }
 0x521   :  { %286 = vrot.lane.b32.xlu1 %v282_v39, %s2733_s23  ;;  %v895_v56 = vrot.slane %v282_v39, 6 }
 0x523   :  { %v909_v60 = vsel %vm908_vm2, %v2862_v21, %v895_v56  ;;  %v692_v56 = vld [vmem:[#allocation2 + $0xc] sm:$0x3] }
 0x593   :  { %v287_v40 = vpop.permute.xlu1 %286 }
 0x594   :  { %2315 = vmatmul.mubr.msk.f32.vlgmr.msra.gmra.mxu0 %vm82_vm1, %v287_v40 }
 0x595   :  { %2329 = vmatpush3.msra.mxu0 %v2815_v1  ;;  %2336 = vmatprep.mubr.msk.f32.mxu0 %vm2737_vm0, %v2736_v0 }
 0x596   :  { %2330 = vmatprep.subr.mxu0 %v2736_v0 }
 0x597   :  { %2331 = vmatpush3.msra.mxu0 %v2820_v2 }
 0x598   :  { %2332 = vmatprep.subr.mxu0 %v2736_v0 }
 0x599   :  { %2333 = vmatpush3.msra.mxu0 %v2828_v3 }
 0x59a   :  { %2334 = vmatprep.subr.mxu0 %v2736_v0 }
 0x59b   :  { %2335 = vmatpush3.msra.mxu0 %v2837_v4 }
 0x59c   :  { %2350 = vmatprep.subr.mxu0 %v2736_v0 }
 0x654   :  { %v356_v42 = vpop.f32.mrf.mxu0 }
 0x655   :  { %v360_v43 = vadd.f32 %v356_v42, %v284_v41  ;;  %v590_v42 = vld [vmem:[#allocation2 + $0xa] sm:$0x3] }
 0x656   :  { %v2316_v44 = vpop.f32.mrf.mxu0 }
 0x657   :  { %2531 = vtanh.f32 %v360_v43  ;;  %v2149_v46 = vmul.f32 -1.442695, %v360_v43 }
 0x659   :  { %2533 = vpow2.f32 %v2149_v46 }
 0x664   :  { %v2532_v45 = vpop.eup %2531 }
 0x665   :  { %370 = vrot.lane.b32.xlu0 %v2532_v45, %s2738_s1 }
 0x666   :  { %v2534_v47 = vpop.eup %2533 }
 0x667   :  { %v364_v48 = vadd.f32 1.0, %v2534_v47 }
 0x669   :  { %2535 = vrcp.f32 %v364_v48 }
 0x676   :  { %v2536_v49 = vpop.eup %2535 }
 0x677   :  { %v368_v52 = vmul.f32 %v2536_v49, %v276_v36 }
 0x6d7   :  { %v371_v50 = vpop.permute.xlu0 %370 }
 0x6d8   :  { %v373_v51 = vmul.f32 %v2536_v49, %v371_v50 }
 0x6da   :  { %375 = vrot.lane.b32.xlu1 %v373_v51, %s2733_s23 }
 0x74c   :  { %v376_v53 = vpop.permute.xlu1 %375 }
 0x74d   :  { %v378_v54 = vadd.f32 %v376_v53, %v368_v52 }
 0x74f   :  { %2537 = vtanh.f32 %v378_v54 }
 0x75c   :  { %v2538_v55 = vpop.eup %2537 }
 0x75d   :  { %381 = vrot.lane.b32.xlu0 %v2538_v55, %s2738_s1 }
 0x7cf   :  { %v382_v57 = vpop.permute.xlu0 %381 }
 0x7d0   :  { %v384_v58 = vmul.f32 %v2536_v49, %v382_v57 }
 0x7d2   :  { %v897_v59 = vrot.slane %v384_v58, 4  ;;  %388 = vrot.lane.b32.xlu1 %v384_v58, %s2733_s23 }
 0x7d4   :  { %v911_v61 = vsel %vm910_vm3, %v909_v60, %v897_v59 }
 0x844   :  { %v389_v62 = vpop.permute.xlu1 %388 }
 0x845   :  { %2326 = vmatmul.mubr.msk.f32.vlgmr.msra.gmra.mxu1 %vm82_vm1, %v389_v62 }
 0x846   :  { %2340 = vmatpush3.msra.mxu1 %v2815_v1  ;;  %2347 = vmatprep.mubr.msk.f32.mxu1 %vm2737_vm0, %v2736_v0 }
 0x847   :  { %2341 = vmatprep.subr.mxu1 %v2736_v0 }
 0x848   :  { %2342 = vmatpush3.msra.mxu1 %v2820_v2 }
 0x849   :  { %2343 = vmatprep.subr.mxu1 %v2736_v0 }
 0x84a   :  { %2344 = vmatpush3.msra.mxu1 %v2828_v3 }
 0x84b   :  { %2345 = vmatprep.subr.mxu1 %v2736_v0 }
 0x84c   :  { %2346 = vmatpush3.msra.mxu1 %v2837_v4 }
 0x84d   :  { %2361 = vmatprep.subr.mxu1 %v2736_v0 }
 0x905   :  { %v458_v5 = vpop.f32.mrf.mxu1 }
 0x906   :  { %v462_v6 = vadd.f32 %v458_v5, %v386_v63 }
 0x907   :  { %v2327_v7 = vpop.f32.mrf.mxu1 }
 0x908   :  { %2539 = vtanh.f32 %v462_v6  ;;  %v2151_v9 = vmul.f32 -1.442695, %v462_v6 }
 0x90a   :  { %2541 = vpow2.f32 %v2151_v9 }
 0x915   :  { %v2540_v8 = vpop.eup %2539 }
 0x916   :  { %472 = vrot.lane.b32.xlu0 %v2540_v8, %s2738_s1 }
 0x917   :  { %v2542_v10 = vpop.eup %2541 }
 0x918   :  { %v466_v11 = vadd.f32 1.0, %v2542_v10 }
 0x91a   :  { %2543 = vrcp.f32 %v466_v11 }
 0x927   :  { %v2544_v12 = vpop.eup %2543 }
 0x928   :  { %v470_v15 = vmul.f32 %v2544_v12, %v378_v54 }
 0x988   :  { %v473_v13 = vpop.permute.xlu0 %472 }
 0x989   :  { %v475_v14 = vmul.f32 %v2544_v12, %v473_v13 }
 0x98b   :  { %477 = vrot.lane.b32.xlu1 %v475_v14, %s2733_s23 }
 0x9fd   :  { %v478_v16 = vpop.permute.xlu1 %477 }
 0x9fe   :  { %v480_v17 = vadd.f32 %v478_v16, %v470_v15 }
 0xa00   :  { %2545 = vtanh.f32 %v480_v17 }
 0xa0d   :  { %v2546_v18 = vpop.eup %2545 }
 0xa0e   :  { %483 = vrot.lane.b32.xlu0 %v2546_v18, %s2738_s1 }
 0xa80   :  { %v484_v19 = vpop.permute.xlu0 %483 }
 0xa81   :  { %v486_v20 = vmul.f32 %v2544_v12, %v484_v19  ;;  %v794_v19 = vld [vmem:[#allocation2 + $0xe] sm:$0x3] }
 0xa83   :  { %v899_v21 = vrot.slane %v486_v20, 2  ;;  %490 = vrot.lane.b32.xlu1 %v486_v20, %s2733_s23 }
 0xa85   :  { %v2915_v22 = vsel %vm912_vm4, %v911_v61, %v899_v21 }
 0xaf5   :  { %v491_v23 = vpop.permute.xlu1 %490 }
 0xaf6   :  { %2337 = vmatmul.mubr.msk.f32.vlgmr.msra.gmra.mxu0 %vm82_vm1, %v491_v23 }
 0xaf7   :  { %2351 = vmatpush3.msra.mxu0 %v2815_v1  ;;  %2358 = vmatprep.mubr.msk.f32.mxu0 %vm2737_vm0, %v2736_v0 }
 0xaf8   :  { %2352 = vmatprep.subr.mxu0 %v2736_v0 }
 0xaf9   :  { %2353 = vmatpush3.msra.mxu0 %v2820_v2 }
 0xafa   :  { %2354 = vmatprep.subr.mxu0 %v2736_v0 }
 0xafb   :  { %2355 = vmatpush3.msra.mxu0 %v2828_v3 }
 0xafc   :  { %2356 = vmatprep.subr.mxu0 %v2736_v0 }
 0xafd   :  { %2357 = vmatpush3.msra.mxu0 %v2837_v4 }
 0xbb6   :  { %v560_v25 = vpop.f32.mrf.mxu0 }
 0xbb7   :  { %v564_v26 = vadd.f32 %v560_v25, %v488_v24 }
 0xbb8   :  { %v2338_v27 = vpop.f32.mrf.mxu0 }
 0xbb9   :  { %2547 = vtanh.f32 %v564_v26  ;;  %v2153_v29 = vmul.f32 -1.442695, %v564_v26 }
 0xbbb   :  { %2549 = vpow2.f32 %v2153_v29 }
 0xbc6   :  { %v2548_v28 = vpop.eup %2547 }
 0xbc7   :  { %574 = vrot.lane.b32.xlu0 %v2548_v28, %s2738_s1 }
 0xbc8   :  { %v2550_v30 = vpop.eup %2549 }
 0xbc9   :  { %v568_v31 = vadd.f32 1.0, %v2550_v30 }
 0xbcb   :  { %2551 = vrcp.f32 %v568_v31 }
 0xbd8   :  { %v2552_v32 = vpop.eup %2551 }
 0xbd9   :  { %v572_v35 = vmul.f32 %v2552_v32, %v480_v17 }
 0xc39   :  { %v575_v33 = vpop.permute.xlu0 %574 }
 0xc3a   :  { %v577_v34 = vmul.f32 %v2552_v32, %v575_v33 }
 0xc3c   :  { %579 = vrot.lane.b32.xlu1 %v577_v34, %s2733_s23 }
 0xcae   :  { %v580_v36 = vpop.permute.xlu1 %579 }
 0xcaf   :  { %v582_v37 = vadd.f32 %v580_v36, %v572_v35  ;;  %v920_v35 = vld [vmem:[#allocation5 + $0x18] sm:$0xff]  ;;  %v919_v36 = vld [vmem:[#allocation5 + $0x10] sm:$0xff] }
 0xcb0   :  { %2372 = vmatprep.subr.mxu0 %v920_v35 }
 0xcb1   :  { %2553 = vtanh.f32 %v582_v37 }
 0xcbe   :  { %v2554_v38 = vpop.eup %2553 }
 0xcbf   :  { %585 = vrot.lane.b32.xlu0 %v2554_v38, %s2738_s1  ;;  %v918_v38 = vld [vmem:[#allocation5 + $0x8] sm:$0xff] }
 0xd31   :  { %v586_v39 = vpop.permute.xlu0 %585 }
 0xd32   :  { %v2930_v40 = vmul.f32 %v2552_v32, %v586_v39  ;;  %v2982_v39 = vld [vmem:[%s3185_s2 + $0x8] sm:$0xff] }
 0xd34   :  { %592 = vrot.lane.b32.xlu1 %v2930_v40, %s2733_s23 }
 0xda6   :  { %v593_v41 = vpop.permute.xlu1 %592 }
 0xda7   :  { %2348 = vmatmul.mubr.msk.f32.vlgmr.msra.gmra.mxu1 %vm82_vm1, %v593_v41 }
 0xda8   :  { %2362 = vmatpush3.msra.mxu1 %v2815_v1  ;;  %2369 = vmatprep.mubr.msk.f32.mxu1 %vm2737_vm0, %v2736_v0 }
 0xda9   :  { %2363 = vmatprep.subr.mxu1 %v2736_v0 }
 0xdaa   :  { %2364 = vmatpush3.msra.mxu1 %v2820_v2 }
 0xdab   :  { %2365 = vmatprep.subr.mxu1 %v2736_v0 }
 0xdac   :  { %2366 = vmatpush3.msra.mxu1 %v2828_v3 }
 0xdad   :  { %2367 = vmatprep.subr.mxu1 %v2736_v0 }
 0xdae   :  { %2368 = vmatpush3.msra.mxu1 %v2837_v4 }
 0xdaf   :  { %2383 = vmatprep.subr.mxu1 %v2736_v0 }
 0xe67   :  { %v662_v43 = vpop.f32.mrf.mxu1 }
 0xe68   :  { %v666_v1 = vadd.f32 %v662_v43, %v590_v42  ;;  %v2993_v42 = vld [vmem:[%s3185_s2] sm:$0xff] }
 0xe69   :  { %v2349_v44 = vpop.f32.mrf.mxu1 }
 0xe6a   :  { %2555 = vtanh.f32 %v666_v1  ;;  %v2155_v46 = vmul.f32 -1.442695, %v666_v1 }
 0xe6c   :  { %2557 = vpow2.f32 %v2155_v46 }
 0xe77   :  { %v2556_v45 = vpop.eup %2555 }
 0xe78   :  { %676 = vrot.lane.b32.xlu0 %v2556_v45, %s2738_s1 }
 0xe79   :  { %v2558_v2 = vpop.eup %2557 }
 0xe7a   :  { %v670_v47 = vadd.f32 1.0, %v2558_v2 }
 0xe7c   :  { %2559 = vrcp.f32 %v670_v47 }
 0xe89   :  { %v2560_v3 = vpop.eup %2559 }
 0xe8a   :  { %v674_v4 = vmul.f32 %v2560_v3, %v582_v37  ;;  %v2970_v37 = vld [vmem:[%s3185_s2 + $0x18] sm:$0xff] }
 0xeea   :  { %v677_v48 = vpop.permute.xlu0 %676 }
 0xeeb   :  { %v679_v49 = vmul.f32 %v2560_v3, %v677_v48 }
 0xeed   :  { %681 = vrot.lane.b32.xlu1 %v679_v49, %s2733_s23 }
 0xf5f   :  { %v682_v50 = vpop.permute.xlu1 %681 }
 0xf60   :  { %v684_v51 = vadd.f32 %v682_v50, %v674_v4 }
 0xf62   :  { %2561 = vtanh.f32 %v684_v51 }
 0xf6f   :  { %v2562_v52 = vpop.eup %2561 }
 0xf70   :  { %687 = vrot.lane.b32.xlu0 %v2562_v52, %s2738_s1 }
 0xfe2   :  { %v688_v53 = vpop.permute.xlu0 %687 }
 0xfe3   :  { %v690_v54 = vmul.f32 %v2560_v3, %v688_v53  ;;  %v2160_v3 = vld [vmem:[%s3187_s4] ss:$0 sm:$0xff] }
 0xfe5   :  { %694 = vrot.lane.b32.xlu1 %v690_v54, %s2733_s23  ;;  %v901_v12 = vrot.slane %v690_v54, 6 }
 0xfe7   :  { %v914_v16 = vsel %vm908_vm2, %v2930_v40, %v901_v12  ;;  %v917_v40 = vld [vmem:[#allocation5] sm:$0xff] }
0x1057   :  { %v695_v55 = vpop.permute.xlu1 %694 }
0x1058   :  { %2359 = vmatmul.mubr.msk.f32.vlgmr.msra.gmra.mxu0 %vm82_vm1, %v695_v55 }
0x1059   :  { %2373 = vmatpush3.msra.mxu0 %v920_v35 }
0x105a   :  { %2374 = vmatprep.subr.mxu0 %v919_v36 }
0x105b   :  { %2375 = vmatpush3.msra.mxu0 %v919_v36 }
0x105c   :  { %2376 = vmatprep.subr.mxu0 %v918_v38 }
0x105d   :  { %2377 = vmatpush3.msra.mxu0 %v918_v38 }
0x105e   :  { %2378 = vmatprep.subr.mxu0 %v917_v40 }
0x105f   :  { %2379 = vmatpush3.msra.mxu0 %v917_v40 }
0x1060   :  { %2394 = vmatprep.subr.mxu0 %v2736_v0 }
0x1118   :  { %v764_v57 = vpop.f32.mrf.mxu0 }
0x1119   :  { %v768_v58 = vadd.f32 %v764_v57, %v692_v56 }
0x111a   :  { %v2360_v59 = vpop.f32.mrf.mxu0 }
0x111b   :  { %2563 = vtanh.f32 %v768_v58  ;;  %v2157_v61 = vmul.f32 -1.442695, %v768_v58 }
0x111d   :  { %2565 = vpow2.f32 %v2157_v61 }
0x1128   :  { %v2564_v60 = vpop.eup %2563 }
0x1129   :  { %778 = vrot.lane.b32.xlu0 %v2564_v60, %s2738_s1 }
0x112a   :  { %v2566_v62 = vpop.eup %2565 }
0x112b   :  { %v772_v63 = vadd.f32 1.0, %v2566_v62 }
0x112d   :  { %2567 = vrcp.f32 %v772_v63 }
0x113a   :  { %v2568_v5 = vpop.eup %2567 }
0x113b   :  { %v776_v8 = vmul.f32 %v2568_v5, %v684_v51 }
0x119b   :  { %v779_v6 = vpop.permute.xlu0 %778 }
0x119c   :  { %v781_v7 = vmul.f32 %v2568_v5, %v779_v6 }
0x119e   :  { %783 = vrot.lane.b32.xlu1 %v781_v7, %s2733_s23 }
0x1210   :  { %v784_v9 = vpop.permute.xlu1 %783 }
0x1211   :  { %v786_v10 = vadd.f32 %v784_v9, %v776_v8 }
0x1213   :  { %2569 = vtanh.f32 %v786_v10 }
0x1220   :  { %v2570_v11 = vpop.eup %2569 }
0x1221   :  { %789 = vrot.lane.b32.xlu0 %v2570_v11, %s2738_s1 }
0x1293   :  { %v790_v13 = vpop.permute.xlu0 %789 }
0x1294   :  { %v792_v14 = vmul.f32 %v2568_v5, %v790_v13 }
0x1296   :  { %v903_v15 = vrot.slane %v792_v14, 4  ;;  %796 = vrot.lane.b32.xlu1 %v792_v14, %s2733_s23 }
0x1298   :  { %v2957_v17 = vsel %vm910_vm3, %v914_v16, %v903_v15 }
0x1308   :  { %v797_v18 = vpop.permute.xlu1 %796 }
0x1309   :  { %2370 = vmatmul.mubr.msk.f32.vlgmr.msra.gmra.mxu1 %vm82_vm1, %v797_v18 }
0x130a   :  { %2391 = vmatprep.mubr.msk.f32.mxu1 %vm2737_vm0, %v2736_v0  ;;  %2384 = vmatpush3.msra.mxu1 %v2970_v37 }
0x130b   :  { %2385 = vmatprep.subr.mxu1 %v2736_v0 }
0x13c9   :  { %v866_v20 = vpop.f32.mrf.mxu1 }
0x13ca   :  { %v870_v21 = vadd.f32 %v866_v20, %v794_v19 }
0x13cb   :  { %v2371_v23 = vpop.f32.mrf.mxu1 }
0x13cc   :  { %2571 = vtanh.f32 %v870_v21  ;;  %v2159_v25 = vmul.f32 -1.442695, %v870_v21 }
0x13ce   :  { %2573 = vpow2.f32 %v2159_v25 }
0x13d9   :  { %v2572_v24 = vpop.eup %2571 }
0x13da   :  { %880 = vrot.lane.b32.xlu0 %v2572_v24, %s2738_s1 }
0x13db   :  { %v2574_v26 = vpop.eup %2573 }
0x13dc   :  { %v874_v27 = vadd.f32 1.0, %v2574_v26 }
0x13de   :  { %2575 = vrcp.f32 %v874_v27 }
0x13eb   :  { %v2576_v28 = vpop.eup %2575 }
0x13ec   :  { %v878_v31 = vmul.f32 %v2576_v28, %v786_v10 }
0x144c   :  { %v881_v29 = vpop.permute.xlu0 %880 }
0x144d   :  { %v883_v30 = vmul.f32 %v2576_v28, %v881_v29 }
0x144f   :  { %885 = vrot.lane.b32.xlu1 %v883_v30, %s2733_s23 }
0x1453   :  { %930 = vrot.lane.b32.xlu1 %v2915_v22, %s2733_s23  ;;  %v2976_v22 = vld [vmem:[%s3185_s2 + $0x10] sm:$0xff] }
0x1454   :  { %2386 = vmatpush3.msra.mxu1 %v2976_v22 }
0x1455   :  { %2387 = vmatprep.subr.mxu1 %v2736_v0 }
0x1456   :  { %2388 = vmatpush3.msra.mxu1 %v2982_v39 }
0x1457   :  { %2389 = vmatprep.subr.mxu1 %v2736_v0 }
0x1458   :  { %2390 = vmatpush3.msra.mxu1 %v2993_v42 }
0x1459   :  { %2392 = vmatmul.mubr.f32.vlgmr.msra.gmra.mxu1 %v2736_v0  ;;  %2405 = vmatprep.subr.mxu1 %v2736_v0 }
0x145a   :  { %2406 = vmatpush3.msra.mxu1 %v2970_v37  ;;  %2413 = vmatprep.mubr.msk.f32.mxu1 %vm2737_vm0, %v2736_v0 }
0x145b   :  { %2407 = vmatprep.subr.mxu1 %v2736_v0 }
0x145c   :  { %2408 = vmatpush3.msra.mxu1 %v2976_v22 }
0x145d   :  { %2409 = vmatprep.subr.mxu1 %v2736_v0 }
0x145e   :  { %2410 = vmatpush3.msra.mxu1 %v2982_v39 }
0x145f   :  { %2411 = vmatprep.subr.mxu1 %v2736_v0 }
0x1460   :  { %2412 = vmatpush3.msra.mxu1 %v2993_v42 }
0x1461   :  { %2427 = vmatprep.subr.mxu1 %v2736_v0 }
0x14c1   :  { %v886_v32 = vpop.permute.xlu1 %885 }
0x14c2   :  { %v888_v33 = vadd.f32 %v886_v32, %v878_v31 }
0x14c4   :  { %2577 = vtanh.f32 %v888_v33 }
0x14c5   :  { %v931_v34 = vpop.permute.xlu1 %930 }
0x14c6   :  { %2380 = vmatprep.mubr.msk.f32.mxu0 %vm82_vm1, %v931_v34 }
0x14d1   :  { %v2578_v41 = vpop.eup %2577 }
0x14d2   :  { %891 = vrot.lane.b32.xlu0 %v2578_v41, %s2738_s1 }
0x1519   :  { %v1083_v2 = vpop.f32.mrf.mxu1 }
0x151b   :  { %v2393_v47 = vpop.f32.mrf.mxu1 }
0x1544   :  { %v892_v43 = vpop.permute.xlu0 %891 }
0x1545   :  { %v894_v1 = vmul.f32 %v2576_v28, %v892_v43 }
0x1547   :  { %v906_v44 = vrot.slane %v894_v1, 2 }
0x1549   :  { %v916_v45 = vsel %vm912_vm4, %v2957_v17, %v906_v44 }
0x154a   :  { %932 = vrot.lane.b32.xlu0 %v916_v45, %s2733_s23 }
0x15bc   :  { %v933_v46 = vpop.permute.xlu0 %932 }
0x15bd   :  { %2381 = vmatmul.mubr.msk.f32.vlgmr.msra.gmra.mxu0 %vm82_vm1, %v933_v46 }
0x15be   :  { %2395 = vmatpush3.msra.mxu0 %v2970_v37  ;;  %2402 = vmatprep.mubr.msk.f32.mxu0 %vm2737_vm0, %v2736_v0 }
0x15bf   :  { %2396 = vmatprep.subr.mxu0 %v2736_v0 }
0x15c0   :  { %2397 = vmatpush3.msra.mxu0 %v2976_v22 }
0x15c1   :  { %2398 = vmatprep.subr.mxu0 %v2736_v0 }
0x15c2   :  { %2399 = vmatpush3.msra.mxu0 %v2982_v39 }
0x15c3   :  { %2400 = vmatprep.subr.mxu0 %v2736_v0 }
0x15c4   :  { %2401 = vmatpush3.msra.mxu0 %v2993_v42 }
0x15c5   :  { %2416 = vmatprep.subr.mxu0 %v2736_v0 }
0x167d   :  { %v2382_v48 = vpop.f32.mrf.mxu0 }
0x167e   :  { %v3025_v49 = vadd.f32 %v2382_v48, %v2160_v3 }
0x167f   :  { %v1004_v4 = vpop.f32.mrf.mxu0 }
0x1680   :  { %v3027_v50 = vadd.f32 %v2160_v3, %v1004_v4 }
0x1682   :  { %v1087_v51 = vadd.f32 %v1083_v2, %v3027_v50 }
0x1684   :  { %2579 = vtanh.f32 %v1087_v51  ;;  %v2163_v53 = vmul.f32 -1.442695, %v1087_v51 }
0x1686   :  { %2581 = vpow2.f32 %v2163_v53 }
0x1691   :  { %v2580_v52 = vpop.eup %2579 }
0x1692   :  { %1097 = vrot.lane.b32.xlu1 %v2580_v52, %s2738_s1 }
0x1693   :  { %v2582_v54 = vpop.eup %2581 }
0x1694   :  { %v1091_v55 = vadd.f32 1.0, %v2582_v54 }
0x1696   :  { %2583 = vrcp.f32 %v1091_v55 }
0x16a3   :  { %v2584_v56 = vpop.eup %2583 }
0x16a4   :  { %v1095_v59 = vmul.f32 0.0, %v2584_v56 }
0x1704   :  { %v1098_v57 = vpop.permute.xlu1 %1097 }
0x1705   :  { %v1100_v58 = vmul.f32 %v2584_v56, %v1098_v57 }
0x1707   :  { %1102 = vrot.lane.b32.xlu0 %v1100_v58, %s2733_s23 }
0x1779   :  { %v1103_v60 = vpop.permute.xlu0 %1102 }
0x177a   :  { %v1105_v61 = vadd.f32 %v1103_v60, %v1095_v59 }
0x177c   :  { %2585 = vtanh.f32 %v1105_v61  ;;  %v1200_v18 = vrot.slane %v1105_v61, 6 }
0x1789   :  { %v2586_v62 = vpop.eup %2585 }
0x178a   :  { %1108 = vrot.lane.b32.xlu1 %v2586_v62, %s2738_s1 }
0x17fc   :  { %v1109_v63 = vpop.permute.xlu1 %1108 }
0x17fd   :  { %v3033_v5 = vmul.f32 %v2584_v56, %v1109_v63 }
0x17ff   :  { %1114 = vrot.lane.b32.xlu0 %v3033_v5, %s2733_s23 }
0x1871   :  { %v1115_v6 = vpop.permute.xlu0 %1114 }
0x1872   :  { %2403 = vmatmul.mubr.msk.f32.vlgmr.msra.gmra.mxu0 %vm82_vm1, %v1115_v6 }
0x1873   :  { %2417 = vmatpush3.msra.mxu0 %v2970_v37  ;;  %2424 = vmatprep.mubr.msk.f32.mxu0 %vm2737_vm0, %v2736_v0 }
0x1874   :  { %2418 = vmatprep.subr.mxu0 %v2736_v0 }
0x1875   :  { %2419 = vmatpush3.msra.mxu0 %v2976_v22 }
0x1876   :  { %2420 = vmatprep.subr.mxu0 %v2736_v0 }
0x1877   :  { %2421 = vmatpush3.msra.mxu0 %v2982_v39 }
0x1878   :  { %2422 = vmatprep.subr.mxu0 %v2736_v0 }
0x1879   :  { %2423 = vmatpush3.msra.mxu0 %v2993_v42 }
0x187a   :  { %2438 = vmatprep.subr.mxu0 %v2736_v0 }
0x1932   :  { %v1184_v7 = vpop.f32.mrf.mxu0 }
0x1933   :  { %v1189_v8 = vrot.slane %v1184_v7, 6 }
0x1934   :  { %v2404_v9 = vpop.f32.mrf.mxu0 }
0x1935   :  { %v1191_v10 = vadd.f32 %v1189_v8, %v3027_v50 }
0x1937   :  { %2587 = vtanh.f32 %v1191_v10  ;;  %v2165_v12 = vmul.f32 -1.442695, %v1191_v10 }
0x1939   :  { %2589 = vpow2.f32 %v2165_v12 }
0x1944   :  { %v2588_v11 = vpop.eup %2587 }
0x1945   :  { %1204 = vrot.lane.b32.xlu1 %v2588_v11, %s2738_s1 }
0x1946   :  { %v2590_v13 = vpop.eup %2589 }
0x1947   :  { %v1195_v14 = vadd.f32 1.0, %v2590_v13 }
0x1949   :  { %2591 = vrcp.f32 %v1195_v14 }
0x1956   :  { %v2592_v15 = vpop.eup %2591 }
0x1957   :  { %v1202_v19 = vmul.f32 %v2592_v15, %v1200_v18 }
0x19b7   :  { %v1205_v16 = vpop.permute.xlu1 %1204 }
0x19b8   :  { %v1207_v17 = vmul.f32 %v2592_v15, %v1205_v16 }
0x19ba   :  { %1209 = vrot.lane.b32.xlu0 %v1207_v17, %s2733_s23 }
0x1a2c   :  { %v1210_v20 = vpop.permute.xlu0 %1209 }
0x1a2d   :  { %v1212_v21 = vadd.f32 %v1210_v20, %v1202_v19 }
0x1a2f   :  { %2593 = vtanh.f32 %v1212_v21  ;;  %v1309_v41 = vrot.slane %v1212_v21, 6 }
0x1a3c   :  { %v2594_v23 = vpop.eup %2593 }
0x1a3d   :  { %1215 = vrot.lane.b32.xlu1 %v2594_v23, %s2738_s1 }
0x1aaf   :  { %v1216_v24 = vpop.permute.xlu1 %1215 }
0x1ab0   :  { %v1218_v25 = vmul.f32 %v2592_v15, %v1216_v24 }
0x1ab2   :  { %v1220_v26 = vrot.slane %v1218_v25, 2 }
0x1ab4   :  { %1223 = vrot.lane.b32.xlu0 %v1220_v26, %s2733_s23  ;;  %v1222_v47 = vadd.f32 %v1220_v26, %v3033_v5 }
0x1b26   :  { %v1224_v27 = vpop.permute.xlu0 %1223 }
0x1b27   :  { %2414 = vmatmul.mubr.msk.f32.vlgmr.msra.gmra.mxu1 %vm82_vm1, %v1224_v27 }
0x1b28   :  { %2428 = vmatpush3.msra.mxu1 %v2970_v37  ;;  %2435 = vmatprep.mubr.msk.f32.mxu1 %vm2737_vm0, %v2736_v0 }
0x1b29   :  { %2429 = vmatprep.subr.mxu1 %v2736_v0 }
0x1b2a   :  { %2430 = vmatpush3.msra.mxu1 %v2976_v22 }
0x1b2b   :  { %2431 = vmatprep.subr.mxu1 %v2736_v0 }
0x1b2c   :  { %2432 = vmatpush3.msra.mxu1 %v2982_v39 }
0x1b2d   :  { %2433 = vmatprep.subr.mxu1 %v2736_v0 }
0x1b2e   :  { %2434 = vmatpush3.msra.mxu1 %v2993_v42 }
0x1b2f   :  { %2449 = vmatprep.subr.mxu1 %v2736_v0 }
0x1be7   :  { %v1293_v28 = vpop.f32.mrf.mxu1 }
0x1be8   :  { %v1298_v29 = vrot.slane %v1293_v28, 4 }
0x1be9   :  { %v2415_v30 = vpop.f32.mrf.mxu1 }
0x1bea   :  { %v1300_v31 = vadd.f32 %v1298_v29, %v3027_v50 }
0x1bec   :  { %2595 = vtanh.f32 %v1300_v31  ;;  %v2167_v33 = vmul.f32 -1.442695, %v1300_v31 }
0x1bee   :  { %2597 = vpow2.f32 %v2167_v33 }
0x1bf9   :  { %v2596_v32 = vpop.eup %2595 }
0x1bfa   :  { %1313 = vrot.lane.b32.xlu1 %v2596_v32, %s2738_s1 }
0x1bfb   :  { %v2598_v34 = vpop.eup %2597 }
0x1bfc   :  { %v1304_v35 = vadd.f32 1.0, %v2598_v34 }
0x1bfe   :  { %2599 = vrcp.f32 %v1304_v35 }
0x1c0b   :  { %v2600_v36 = vpop.eup %2599 }
0x1c0c   :  { %v1311_v43 = vmul.f32 %v2600_v36, %v1309_v41 }
0x1c6c   :  { %v1314_v38 = vpop.permute.xlu1 %1313 }
0x1c6d   :  { %v1316_v40 = vmul.f32 %v2600_v36, %v1314_v38 }
0x1c6f   :  { %1318 = vrot.lane.b32.xlu0 %v1316_v40, %s2733_s23 }
0x1ce1   :  { %v1319_v1 = vpop.permute.xlu0 %1318 }
0x1ce2   :  { %v1321_v44 = vadd.f32 %v1319_v1, %v1311_v43 }
0x1ce4   :  { %2601 = vtanh.f32 %v1321_v44  ;;  %v1418_v62 = vrot.slane %v1321_v44, 6 }
0x1cf1   :  { %v2602_v45 = vpop.eup %2601 }
0x1cf2   :  { %1324 = vrot.lane.b32.xlu1 %v2602_v45, %s2738_s1 }
0x1d64   :  { %v1325_v46 = vpop.permute.xlu1 %1324 }
0x1d65   :  { %v1327_v2 = vmul.f32 %v2600_v36, %v1325_v46 }
0x1d67   :  { %v1329_v3 = vrot.slane %v1327_v2, 4 }
0x1d69   :  { %v1331_v48 = vadd.f32 %v1329_v3, %v1222_v47  ;;  %1332 = vrot.lane.b32.xlu0 %v1329_v3, %s2733_s23 }
0x1ddb   :  { %v1333_v4 = vpop.permute.xlu0 %1332 }
0x1ddc   :  { %2425 = vmatmul.mubr.msk.f32.vlgmr.msra.gmra.mxu0 %vm82_vm1, %v1333_v4 }
0x1ddd   :  { %2439 = vmatpush3.msra.mxu0 %v2970_v37  ;;  %2446 = vmatprep.mubr.msk.f32.mxu0 %vm2737_vm0, %v2736_v0 }
0x1dde   :  { %2440 = vmatprep.subr.mxu0 %v2736_v0 }
0x1ddf   :  { %2441 = vmatpush3.msra.mxu0 %v2976_v22 }
0x1de0   :  { %2442 = vmatprep.subr.mxu0 %v2736_v0 }
0x1de1   :  { %2443 = vmatpush3.msra.mxu0 %v2982_v39 }
0x1de2   :  { %2444 = vmatprep.subr.mxu0 %v2736_v0 }
0x1de3   :  { %2445 = vmatpush3.msra.mxu0 %v2993_v42 }
0x1de4   :  { %2460 = vmatprep.subr.mxu0 %v2736_v0 }
0x1e9c   :  { %v1402_v51 = vpop.f32.mrf.mxu0 }
0x1e9d   :  { %v1407_v52 = vrot.slane %v1402_v51, 2 }
0x1e9e   :  { %v2426_v53 = vpop.f32.mrf.mxu0 }
0x1e9f   :  { %v1409_v54 = vadd.f32 %v1407_v52, %v3027_v50 }
0x1ea1   :  { %2603 = vtanh.f32 %v1409_v54  ;;  %v2169_v56 = vmul.f32 -1.442695, %v1409_v54 }
0x1ea3   :  { %2605 = vpow2.f32 %v2169_v56 }
0x1eae   :  { %v2604_v55 = vpop.eup %2603 }
0x1eaf   :  { %1422 = vrot.lane.b32.xlu1 %v2604_v55, %s2738_s1 }
0x1eb0   :  { %v2606_v57 = vpop.eup %2605 }
0x1eb1   :  { %v1413_v58 = vadd.f32 1.0, %v2606_v57 }
0x1eb3   :  { %2607 = vrcp.f32 %v1413_v58 }
0x1ec0   :  { %v2608_v59 = vpop.eup %2607 }
0x1ec1   :  { %v1420_v63 = vmul.f32 %v2608_v59, %v1418_v62 }
0x1f21   :  { %v1423_v60 = vpop.permute.xlu1 %1422 }
0x1f22   :  { %v1425_v61 = vmul.f32 %v2608_v59, %v1423_v60 }
0x1f24   :  { %1427 = vrot.lane.b32.xlu0 %v1425_v61, %s2733_s23 }
0x1f96   :  { %v1428_v5 = vpop.permute.xlu0 %1427 }
0x1f97   :  { %v1430_v6 = vadd.f32 %v1428_v5, %v1420_v63 }
0x1f99   :  { %2609 = vtanh.f32 %v1430_v6  ;;  %v1524_v23 = vrot.slane %v1430_v6, 6 }
0x1fa6   :  { %v2610_v50 = vpop.eup %2609 }
0x1fa7   :  { %1433 = vrot.lane.b32.xlu1 %v2610_v50, %s2738_s1 }
0x2019   :  { %v1434_v7 = vpop.permute.xlu1 %1433 }
0x201a   :  { %v1436_v8 = vmul.f32 %v2608_v59, %v1434_v7 }
0x201c   :  { %v1438_v9 = vrot.slane %v1436_v8, 6 }
0x201e   :  { %v1440_v10 = vadd.f32 %v1438_v9, %v1331_v48  ;;  %1441 = vrot.lane.b32.xlu0 %v1438_v9, %s2733_s23 }
0x2090   :  { %v1442_v11 = vpop.permute.xlu0 %1441 }
0x2091   :  { %2436 = vmatmul.mubr.msk.f32.vlgmr.msra.gmra.mxu1 %vm82_vm1, %v1442_v11 }
0x2092   :  { %2450 = vmatpush3.msra.mxu1 %v2970_v37  ;;  %2457 = vmatprep.mubr.msk.f32.mxu1 %vm2737_vm0, %v2736_v0 }
0x2093   :  { %2451 = vmatprep.subr.mxu1 %v2736_v0 }
0x2094   :  { %2452 = vmatpush3.msra.mxu1 %v2976_v22 }
0x2095   :  { %2453 = vmatprep.subr.mxu1 %v2736_v0 }
0x2096   :  { %2454 = vmatpush3.msra.mxu1 %v2982_v39 }
0x2097   :  { %2455 = vmatprep.subr.mxu1 %v2736_v0 }
0x2098   :  { %2456 = vmatpush3.msra.mxu1 %v2993_v42 }
0x2099   :  { %2471 = vmatprep.subr.mxu1 %v2736_v0 }
0x2151   :  { %v1511_v12 = vpop.f32.mrf.mxu1 }
0x2152   :  { %v1515_v13 = vadd.f32 %v1511_v12, %v3025_v49 }
0x2153   :  { %v2437_v14 = vpop.f32.mrf.mxu1 }
0x2154   :  { %2611 = vtanh.f32 %v1515_v13  ;;  %v2171_v16 = vmul.f32 -1.442695, %v1515_v13 }
0x2156   :  { %2613 = vpow2.f32 %v2171_v16 }
0x2161   :  { %v2612_v15 = vpop.eup %2611 }
0x2162   :  { %1528 = vrot.lane.b32.xlu1 %v2612_v15, %s2738_s1 }
0x2163   :  { %v2614_v17 = vpop.eup %2613 }
0x2164   :  { %v1519_v18 = vadd.f32 1.0, %v2614_v17 }
0x2166   :  { %2615 = vrcp.f32 %v1519_v18 }
0x2173   :  { %v2616_v19 = vpop.eup %2615 }
0x2174   :  { %v1526_v24 = vmul.f32 %v2616_v19, %v1524_v23 }
0x21d4   :  { %v1529_v20 = vpop.permute.xlu1 %1528 }
0x21d5   :  { %v1531_v21 = vmul.f32 %v2616_v19, %v1529_v20 }
0x21d7   :  { %1533 = vrot.lane.b32.xlu0 %v1531_v21, %s2733_s23 }
0x2249   :  { %v1534_v25 = vpop.permute.xlu0 %1533 }
0x224a   :  { %v1536_v26 = vadd.f32 %v1534_v25, %v1526_v24 }
0x224c   :  { %2617 = vtanh.f32 %v1536_v26 }
0x2259   :  { %v2618_v27 = vpop.eup %2617 }
0x225a   :  { %1539 = vrot.lane.b32.xlu1 %v2618_v27, %s2738_s1  ;;  %v1874_v27 = vld [vmem:[#allocation7 + $0x10] sm:$0xff] }
0x22cc   :  { %v1540_v28 = vpop.permute.xlu1 %1539 }
0x22cd   :  { %v1542_v29 = vmul.f32 %v2616_v19, %v1540_v28  ;;  %v1873_v28 = vld [vmem:[#allocation7 + $0x8] sm:$0xff] }
0x22cf   :  { %v1543_v30 = vadd.f32 %v1542_v29, %v1440_v10  ;;  %1545 = vrot.lane.b32.xlu0 %v1542_v29, %s2733_s23 }
0x2341   :  { %v1546_v31 = vpop.permute.xlu0 %1545 }
0x2342   :  { %2447 = vmatmul.mubr.msk.f32.vlgmr.msra.gmra.mxu0 %vm82_vm1, %v1546_v31 }
0x2343   :  { %2461 = vmatpush3.msra.mxu0 %v2970_v37  ;;  %2468 = vmatprep.mubr.msk.f32.mxu0 %vm2737_vm0, %v2736_v0 }
0x2344   :  { %2462 = vmatprep.subr.mxu0 %v2736_v0 }
0x2345   :  { %2463 = vmatpush3.msra.mxu0 %v2976_v22 }
0x2346   :  { %2464 = vmatprep.subr.mxu0 %v2736_v0 }
0x2347   :  { %2465 = vmatpush3.msra.mxu0 %v2982_v39 }
0x2348   :  { %2466 = vmatprep.subr.mxu0 %v2736_v0 }
0x2349   :  { %2467 = vmatpush3.msra.mxu0 %v2993_v42  ;;  %v1631_v42 = vrot.slane %v1536_v26, 6 }
0x234a   :  { %2482 = vmatprep.subr.mxu0 %v2736_v0 }
0x2402   :  { %v1615_v32 = vpop.f32.mrf.mxu0 }
0x2403   :  { %v1620_v33 = vrot.slane %v1615_v32, 6  ;;  %v1970_v32 = vld [vmem:[%s3191_s8 + $0x18] sm:$0xff] }
0x2404   :  { %v2448_v37 = vpop.f32.mrf.mxu0 }
0x2405   :  { %v1622_v34 = vadd.f32 %v1620_v33, %v3025_v49 }
0x2407   :  { %2619 = vtanh.f32 %v1622_v34  ;;  %v2173_v22 = vmul.f32 -1.442695, %v1622_v34 }
0x2409   :  { %2621 = vpow2.f32 %v2173_v22 }
0x2414   :  { %v2620_v35 = vpop.eup %2619 }
0x2415   :  { %1635 = vrot.lane.b32.xlu1 %v2620_v35, %s2738_s1 }
0x2416   :  { %v2622_v36 = vpop.eup %2621 }
0x2417   :  { %v1626_v38 = vadd.f32 1.0, %v2622_v36  ;;  %v1966_v36 = vld [vmem:[%s3190_s7 + $0x18] sm:$0xff] }
0x2419   :  { %2623 = vrcp.f32 %v1626_v38 }
0x2426   :  { %v2624_v39 = vpop.eup %2623 }
0x2427   :  { %v1633_v43 = vmul.f32 %v2624_v39, %v1631_v42 }
0x2487   :  { %v1636_v40 = vpop.permute.xlu1 %1635 }
0x2488   :  { %v1638_v41 = vmul.f32 %v2624_v39, %v1636_v40  ;;  %v1964_v40 = vld [vmem:[%s3190_s7 + $0x8] sm:$0xff] }
0x248a   :  { %1640 = vrot.lane.b32.xlu0 %v1638_v41, %s2733_s23  ;;  %v1963_v41 = vld [vmem:[%s3190_s7] sm:$0xff] }
0x24fc   :  { %v1641_v1 = vpop.permute.xlu0 %1640 }
0x24fd   :  { %v1643_v44 = vadd.f32 %v1641_v1, %v1633_v43  ;;  %v1969_v43 = vld [vmem:[%s3191_s8 + $0x10] sm:$0xff]  ;;  %v1968_v1 = vld [vmem:[%s3191_s8 + $0x8] sm:$0xff] }
0x24ff   :  { %2625 = vtanh.f32 %v1643_v44  ;;  %v1740_v61 = vrot.slane %v1643_v44, 6  ;;  %v1967_v44 = vld [vmem:[%s3191_s8] sm:$0xff]  ;;  %s2739_s8 = smov [#allocation8]  }
0x2500   :  { %s2135_s20 = sshll.u32 %s2739_s8, 4  ;;  %s2136_s20 = int_to_ptr.vmem [resolvable:$true] %s2135_s20 }
0x2501   :  { %p2708_p2 = scmp.lt.s32.totalorder %s2136_s20, %s2136_s20 }
0x250c   :  { %v2626_v45 = vpop.eup %2625 }
0x250d   :  { %1646 = vrot.lane.b32.xlu1 %v2626_v45, %s2738_s1  ;;  %v2178_v45 = vld [vmem:[%s3189_s6] ss:$0 sm:$0xff]  ;;  %s2703_s6 = scalar_lea.vmem %s2136_s20, 32 }
0x250e   :  { %p2704_p1 = scmp.ne.s32.totalorder %s2136_s20, %s2703_s6  ;;  %p2709_p3 = scmp.lt.s32.totalorder %s2703_s6, %s2703_s6 }
0x2510   :  { %p2710_p4 = por %p2709_p3, %p2708_p2 }
0x2512   :  { %p2711_p5 = pnand %p2710_p4, %p2704_p1 }
0x257f   :  { %v1647_v46 = vpop.permute.xlu1 %1646 }
0x2580   :  { %v1649_v2 = vmul.f32 %v2624_v39, %v1647_v46  ;;  %v1965_v39 = vld [vmem:[%s3190_s7 + $0x10] sm:$0xff] }
0x2582   :  { %v1651_v47 = vrot.slane %v1649_v2, 2 }
0x2584   :  { %v1653_v3 = vadd.f32 %v1651_v47, %v1543_v30  ;;  %1654 = vrot.lane.b32.xlu0 %v1651_v47, %s2733_s23  ;;  %v1872_v30 = vld [vmem:[#allocation7] sm:$0xff] }
0x25f6   :  { %v1655_v48 = vpop.permute.xlu0 %1654 }
0x25f7   :  { %2458 = vmatmul.mubr.msk.f32.vlgmr.msra.gmra.mxu1 %vm82_vm1, %v1655_v48 }
0x25f8   :  { %2479 = vmatprep.mubr.msk.f32.mxu1 %vm2737_vm0, %v2736_v0 }
0x26b7   :  { %v1724_v4 = vpop.f32.mrf.mxu1 }
0x26b8   :  { %v1729_v51 = vrot.slane %v1724_v4, 4 }
0x26b9   :  { %v2459_v52 = vpop.f32.mrf.mxu1 }
0x26ba   :  { %v1731_v53 = vadd.f32 %v1729_v51, %v3025_v49  ;;  %v2182_v52 = vld [vmem:[%s3192_s9] ss:$0 sm:$0xff] }
0x26bc   :  { %2627 = vtanh.f32 %v1731_v53  ;;  %v2175_v55 = vmul.f32 -1.442695, %v1731_v53 }
0x26be   :  { %2629 = vpow2.f32 %v2175_v55 }
0x26c9   :  { %v2628_v54 = vpop.eup %2627 }
0x26ca   :  { %1744 = vrot.lane.b32.xlu1 %v2628_v54, %s2738_s1 }
0x26cb   :  { %v2630_v56 = vpop.eup %2629 }
0x26cc   :  { %v1735_v57 = vadd.f32 1.0, %v2630_v56 }
0x26ce   :  { %2631 = vrcp.f32 %v1735_v57 }
0x26db   :  { %v2632_v58 = vpop.eup %2631 }
0x26dc   :  { %v1742_v62 = vmul.f32 %v2632_v58, %v1740_v61 }
0x273c   :  { %v1745_v59 = vpop.permute.xlu1 %1744 }
0x273d   :  { %v1747_v60 = vmul.f32 %v2632_v58, %v1745_v59 }
0x273f   :  { %1749 = vrot.lane.b32.xlu0 %v1747_v60, %s2733_s23 }
0x27b1   :  { %v1750_v63 = vpop.permute.xlu0 %1749 }
0x27b2   :  { %v1752_v5 = vadd.f32 %v1750_v63, %v1742_v62 }
0x27b4   :  { %2633 = vtanh.f32 %v1752_v5  ;;  %v1849_v23 = vrot.slane %v1752_v5, 6 }
0x27c1   :  { %v2634_v6 = vpop.eup %2633 }
0x27c2   :  { %1755 = vrot.lane.b32.xlu1 %v2634_v6, %s2738_s1 }
0x2834   :  { %v1756_v50 = vpop.permute.xlu1 %1755 }
0x2835   :  { %v1758_v7 = vmul.f32 %v2632_v58, %v1756_v50 }
0x2837   :  { %v1760_v8 = vrot.slane %v1758_v7, 4 }
0x2839   :  { %v1762_v9 = vadd.f32 %v1760_v8, %v1653_v3  ;;  %1763 = vrot.lane.b32.xlu0 %v1760_v8, %s2733_s23 }
0x28ab   :  { %v1764_v10 = vpop.permute.xlu0 %1763 }
0x28ac   :  { %2469 = vmatmul.mubr.msk.f32.vlgmr.msra.gmra.mxu0 %vm82_vm1, %v1764_v10 }
0x28ad   :  { %2490 = vmatprep.mubr.msk.f32.mxu0 %vm2737_vm0, %v2736_v0  ;;  %2483 = vmatpush3.msra.mxu0 %v1970_v32 }
0x28ae   :  { %2484 = vmatprep.subr.mxu0 %v2736_v0 }
0x28af   :  { %2485 = vmatpush3.msra.mxu0 %v1969_v43 }
0x28b0   :  { %2486 = vmatprep.subr.mxu0 %v2736_v0 }
0x28b1   :  { %2487 = vmatpush3.msra.mxu0 %v1968_v1 }
0x28b2   :  { %2488 = vmatprep.subr.mxu0 %v2736_v0 }
0x28b3   :  { %2489 = vmatpush3.msra.mxu0 %v1967_v44 }
0x296c   :  { %v1833_v11 = vpop.f32.mrf.mxu0 }
0x296d   :  { %v1838_v12 = vrot.slane %v1833_v11, 2 }
0x296e   :  { %v2470_v13 = vpop.f32.mrf.mxu0 }
0x296f   :  { %v1840_v14 = vadd.f32 %v1838_v12, %v3025_v49  ;;  %v1875_v49 = vld [vmem:[#allocation7 + $0x18] sm:$0xff] }
0x2970   :  { %2472 = vmatpush3.msra.mxu1 %v1875_v49 }
0x2971   :  { %2635 = vtanh.f32 %v1840_v14  ;;  %v2177_v16 = vmul.f32 -1.442695, %v1840_v14  ;;  %2473 = vmatprep.subr.mxu1 %v2736_v0 }
0x2972   :  { %2474 = vmatpush3.msra.mxu1 %v1874_v27 }
0x2973   :  { %2637 = vpow2.f32 %v2177_v16  ;;  %2475 = vmatprep.subr.mxu1 %v2736_v0 }
0x2974   :  { %2476 = vmatpush3.msra.mxu1 %v1873_v28 }
0x2975   :  { %2477 = vmatprep.subr.mxu1 %v2736_v0 }
0x2976   :  { %2478 = vmatpush3.msra.mxu1 %v1872_v30 }
0x2977   :  { %2493 = vmatprep.subr.mxu1 %v2736_v0 }
0x297e   :  { %v2636_v15 = vpop.eup %2635 }
0x297f   :  { %1853 = vrot.lane.b32.xlu1 %v2636_v15, %s2738_s1 }
0x2980   :  { %v2638_v17 = vpop.eup %2637 }
0x2981   :  { %v1844_v18 = vadd.f32 1.0, %v2638_v17 }
0x2983   :  { %2639 = vrcp.f32 %v1844_v18 }
0x2990   :  { %v2640_v19 = vpop.eup %2639 }
0x2991   :  { %v1851_v24 = vmul.f32 %v2640_v19, %v1849_v23 }
0x29f1   :  { %v1854_v20 = vpop.permute.xlu1 %1853 }
0x29f2   :  { %v1856_v21 = vmul.f32 %v2640_v19, %v1854_v20 }
0x29f4   :  { %1858 = vrot.lane.b32.xlu0 %v1856_v21, %s2733_s23 }
0x2a66   :  { %v1859_v25 = vpop.permute.xlu0 %1858 }
0x2a67   :  { %v1861_v26 = vadd.f32 %v1859_v25, %v1851_v24 }
0x2a69   :  { %2641 = vtanh.f32 %v1861_v26 }
0x2a76   :  { %v2642_v29 = vpop.eup %2641 }
0x2a77   :  { %1864 = vrot.lane.b32.xlu1 %v2642_v29, %s2738_s1 }
0x2ae9   :  { %v1865_v31 = vpop.permute.xlu1 %1864 }
0x2aea   :  { %v1867_v33 = vmul.f32 %v2640_v19, %v1865_v31 }
0x2aec   :  { %v1869_v37 = vrot.slane %v1867_v33, 6 }
0x2aee   :  { %v1871_v34 = vadd.f32 %v1869_v37, %v1762_v9  ;;  %1883 = vrot.lane.b32.xlu0 %v1869_v37, %s2733_s23 }
0x2af0   :  { %vm1957_vm5 = vcmp.ge.f32.partialorder %v1871_v34, 0.0  ;;  %v1958_v35 = vmul.f32 0.01, %v1871_v34 }
0x2af2   :  { %v1959_v22 = vsel %vm1957_vm5, %v1871_v34, %v1958_v35 }
0x2af3   :  { %2045 = vrot.lane.b32.xlu1 %v1959_v22, %s2733_s23 }
0x2b60   :  { %v1884_v38 = vpop.permute.xlu0 %1883 }
0x2b61   :  { %2480 = vmatmul.mubr.msk.f32.vlgmr.msra.gmra.mxu1 %vm82_vm1, %v1884_v38 }
0x2b62   :  { %2494 = vmatpush3.msra.mxu1 %v1966_v36  ;;  %2501 = vmatprep.mubr.msk.f32.mxu1 %vm2737_vm0, %v2736_v0 }
0x2b63   :  { %2495 = vmatprep.subr.mxu1 %v2736_v0 }
0x2b64   :  { %2496 = vmatpush3.msra.mxu1 %v1965_v39 }
0x2b65   :  { %2497 = vmatprep.subr.mxu1 %v2736_v0  ;;  %v2046_v42 = vpop.permute.xlu1 %2045 }
0x2b66   :  { %2498 = vmatpush3.msra.mxu1 %v1964_v40 }
0x2b67   :  { %2499 = vmatprep.subr.mxu1 %v2736_v0 }
0x2b68   :  { %2500 = vmatpush3.msra.mxu1 %v1963_v41 }
0x2b69   :  { %2502 = vmatmul.mubr.msk.f32.vlgmr.msra.gmra.mxu1 %vm82_vm1, %v2046_v42 }
0x2c21   :  { %v1953_v46 = vpop.f32.mrf.mxu1 }
0x2c22   :  { %v1954_v2 = vadd.f32 %v2178_v45, %v1953_v46 }
0x2c23   :  { %v2481_v47 = vpop.f32.mrf.mxu1 }
0x2c24   :  { %vm1960_vm6 = vcmp.ge.f32.partialorder %v1954_v2, 0.0  ;;  %v1961_v3 = vmul.f32 0.01, %v1954_v2 }
0x2c26   :  { %v1962_v48 = vsel %vm1960_vm6, %v1954_v2, %v1961_v3 }
0x2c27   :  { %2491 = vmatmul.mubr.msk.f32.vlgmr.msra.gmra.mxu0 %vm82_vm1, %v1962_v48 }
0x2c29   :  { %v2115_v4 = vpop.f32.mrf.mxu1 }
0x2c2b   :  { %v2503_v51 = vpop.f32.mrf.mxu1 }
0x2ce7   :  { %v2040_v0 = vpop.f32.mrf.mxu0 }
0x2ce8   :  { %v2116_v53 = vadd.f32 %v2115_v4, %v2040_v0 }
0x2ce9   :  { %v2492_v54 = vpop.f32.mrf.mxu0 }
0x2cea   :  { %v2126_v55 = vadd.f32 %v2182_v52, %v2116_v53 }
0x2cec   :  { %2128 = vst.msk [vmem:[#allocation8] sm:$0x3] %vm2127_vm7, %v2126_v55 }
0x2ced   :  { %2714 = shalt.err (!%p2711_p5)
}
0x2cee   :  { %2138 = dma.vmem_to_hbm [thread:$0]  %s2136_s20, 32, %s3193_s10, [#allocation4]  }
0x2cef   :  { %2727 = dma.done.wait [#allocation4], 32  }
0x2cf0   :  { %2728 = vsyncadd [#allocation4], 4294967264 }
0x2cf1   :  { %2142 = vsyncpa [#allocation3], 1 }
0x2cf2   :  { %2143 = vsyncpa [#allocation6], 1 }
0x2cf3   :  { %2144 = vsyncpa [#allocation4], 1 }

</bundles_post_ra>
